<compile_context>
chip_gen: v5e
topology: v5e:2x2
jax: 0.10.0
libtpu: 0.0.40
codegen_flags: <defaults>
</compile_context>

<pallas_src>
import functools
import math

import jax
import jax.numpy as jnp
from jax.experimental import pallas as pl
from jax.experimental.pallas import tpu as pltpu

# ---- model hyper-parameters -------------------------------------------------
D_MODEL = 32
N_HEADS = 4
D_K = D_MODEL // N_HEADS
D_FF = 64
EPS = 1e-6


# ---- in-kernel helpers (trace-time, operate on jnp values) ------------------
def _layer_norm_2d(x, a, b):
    # x: (N, D) f32; a, b: (1, D).  Unbiased std, eps added to std (torch).
    mean = jnp.mean(x, axis=-1, keepdims=True)
    d = x.shape[-1]
    var = jnp.sum((x - mean) ** 2, axis=-1, keepdims=True) / (d - 1)
    std = jnp.sqrt(var)
    return a * (x - mean) / (std + EPS) + b


# ---- Pallas kernel: whole batch in one invocation (no grid) ------------------
def decoder_layer_kernel(
        x_ref, m_ref, bias_self_ref, bias_src_ref,
        w_qkv_self_ref, b_qkv_self_ref, w_o_self_ref, b_o_self_ref,
        w_q_src_ref, b_q_src_ref, w_kv_src_ref, b_kv_src_ref,
        w_o_src_ref, b_o_src_ref,
        ff_w1_ref, ff_b1_ref, ff_w2_ref, ff_b2_ref,
        ln_a_ref, ln_b_ref, out_ref, *, batch):
    B = batch
    N, D = x_ref.shape          # N = B*T
    T = N // B
    S = m_ref.shape[0] // B
    bf16 = jnp.bfloat16

    x = x_ref[...]              # (B*T, D) f32 residual stream
    m_bf = m_ref[...]           # (B*S, D) bf16 (cast in wrapper)
    ln_a = ln_a_ref[...]
    ln_b = ln_b_ref[...]

    def split_heads(proj, col0, rows_per_b):
        # proj: (B*rows, cols) f32 -> (H*B, rows, D_K) bf16, head-major stack.
        return jnp.concatenate(
            [proj[:, col0 + h * D_K: col0 + (h + 1) * D_K]
                 .reshape(B, rows_per_b, D_K)
             for h in range(N_HEADS)], axis=0).astype(bf16)

    def merge_heads(oh):
        # (H*B, T, D_K) f32 -> (B*T, D); column order [h0 | h1 | h2 | h3].
        return jnp.concatenate(
            [oh[h * B:(h + 1) * B].reshape(B * T, D_K) for h in range(N_HEADS)],
            axis=-1)

    def attend(qh, kh, vh, bias):
        # qh: (HB, Tq, Dk) bf16; kh/vh: (HB, Tk, Dk) bf16; bias: (HB, Tq, Tk) f32
        # (1/sqrt(d_k) already folded into W_q; mask already additive.)
        s = jnp.einsum('nqd,nkd->nqk', qh, kh,
                       preferred_element_type=jnp.float32) + bias
        s = s - jnp.max(s, axis=-1, keepdims=True)
        p = jnp.exp(s)
        p = p * pl.reciprocal(jnp.sum(p, axis=-1, keepdims=True), approx=True)
        return jnp.einsum('nqk,nkd->nqd', p.astype(bf16), vh,
                          preferred_element_type=jnp.float32)

    # ---- sublayer 0: self-attention (fused QKV projection) ----
    xn = _layer_norm_2d(x, ln_a[0:1, :], ln_b[0:1, :]).astype(bf16)
    qkv = jnp.dot(xn, w_qkv_self_ref[...],
                  preferred_element_type=jnp.float32) + b_qkv_self_ref[...]
    oh = attend(split_heads(qkv, 0, T),
                split_heads(qkv, D, T),
                split_heads(qkv, 2 * D, T),
                bias_self_ref[...])
    o = merge_heads(oh).astype(bf16)
    x = x + (jnp.dot(o, w_o_self_ref[...],
                     preferred_element_type=jnp.float32) + b_o_self_ref[...])

    # ---- sublayer 1: cross-attention (K, V from raw memory) ----
    xn = _layer_norm_2d(x, ln_a[1:2, :], ln_b[1:2, :]).astype(bf16)
    q2 = jnp.dot(xn, w_q_src_ref[...],
                 preferred_element_type=jnp.float32) + b_q_src_ref[...]
    kv = jnp.dot(m_bf, w_kv_src_ref[...],
                 preferred_element_type=jnp.float32) + b_kv_src_ref[...]
    oh = attend(split_heads(q2, 0, T),
                split_heads(kv, 0, S),
                split_heads(kv, D, S),
                bias_src_ref[...])
    o = merge_heads(oh).astype(bf16)
    x = x + (jnp.dot(o, w_o_src_ref[...],
                     preferred_element_type=jnp.float32) + b_o_src_ref[...])

    # ---- sublayer 2: position-wise feed forward ----
    xn = _layer_norm_2d(x, ln_a[2:3, :], ln_b[2:3, :]).astype(bf16)
    h = jnp.maximum(
        jnp.dot(xn, ff_w1_ref[...],
                preferred_element_type=jnp.float32) + ff_b1_ref[...],
        0.0).astype(bf16)
    x = x + (jnp.dot(h, ff_w2_ref[...],
                     preferred_element_type=jnp.float32) + ff_b2_ref[...])

    out_ref[...] = x.astype(out_ref.dtype)   # flat (B*T, D) slab


def decoder_layer_pallas(x, memory, src_mask, tgt_mask, params):
    """x: (B,T,D) f32, memory: (B,S,D) f32, masks: (B,T,{T,S}) f32 0/1."""
    B, T, D = x.shape
    S = memory.shape[1]

    x2 = x.reshape(B * T, D)
    m2 = memory.reshape(B * S, D).astype(jnp.bfloat16)   # bf16 MXU operand

    # additive masks, pre-broadcast over heads: (H*B, Tq, Tk), head-major.
    bias_self = jnp.tile(
        jnp.where(tgt_mask == 0.0, -1e9, 0.0).astype(jnp.float32),
        (N_HEADS, 1, 1))
    bias_src = jnp.tile(
        jnp.where(src_mask == 0.0, -1e9, 0.0).astype(jnp.float32),
        (N_HEADS, 1, 1))

    args = (
        x2, m2, bias_self, bias_src,
        params["w_qkv_self"], params["b_qkv_self"],
        params["w_o_self"], params["b_o_self"],
        params["w_q_src"], params["b_q_src"],
        params["w_kv_src"], params["b_kv_src"],
        params["w_o_src"], params["b_o_src"],
        params["ff_w1"], params["ff_b1"], params["ff_w2"], params["ff_b2"],
        params["ln_a"], params["ln_b"],
    )
    vmem = pl.BlockSpec(memory_space=pltpu.MemorySpace.VMEM)
    out2 = pl.pallas_call(
        functools.partial(decoder_layer_kernel, batch=B),
        out_shape=jax.ShapeDtypeStruct((B * T, D), jnp.float32),
        in_specs=[vmem] * len(args),
        out_specs=vmem,
    )(*args)
    return out2.reshape(B, T, D)


# ---- wrapper-side weight packing ---------------------------------------------
def pack_params(raw):
    """raw: f32 weights in q,k,v,o order.  Folds 1/sqrt(d_k) into W_q/b_q,
    fuses QKV (self) / KV (src), pre-splits the cross-attn query weight and
    casts all matmul weights to bf16 (biases stay f32, added post-accum)."""
    scale = 1.0 / math.sqrt(D_K)
    wq_s, wk_s, wv_s, wo_s = raw["w_self"]
    bq_s, bk_s, bv_s, bo_s = raw["b_self"]
    wq_x, wk_x, wv_x, wo_x = raw["w_src"]
    bq_x, bk_x, bv_x, bo_x = raw["b_src"]

    w_qkv_self = jnp.concatenate([wq_s * scale, wk_s, wv_s], axis=1)   # (D, 3D)
    b_qkv_self = jnp.concatenate([bq_s * scale, bk_s, bv_s])[None, :]  # (1, 3D)
    w_kv_src = jnp.concatenate([wk_x, wv_x], axis=1)                   # (D, 2D)
    b_kv_src = jnp.concatenate([bk_x, bv_x])[None, :]                  # (1, 2D)

    bf = lambda w: w.astype(jnp.bfloat16)
    return dict(
        w_qkv_self=bf(w_qkv_self), b_qkv_self=b_qkv_self,
        w_o_self=bf(wo_s), b_o_self=bo_s[None, :],
        w_q_src=bf(wq_x * scale), b_q_src=(bq_x * scale)[None, :],
        w_kv_src=bf(w_kv_src), b_kv_src=b_kv_src,
        w_o_src=bf(wo_x), b_o_src=bo_x[None, :],
        ff_w1=bf(raw["ff_w1"]), ff_b1=raw["ff_b1"],
        ff_w2=bf(raw["ff_w2"]), ff_b2=raw["ff_b2"],
        ln_a=raw["ln_a"], ln_b=raw["ln_b"],
    )


# ---- pure-JAX f32 reference (direct transcription of the PyTorch module) -----
def _layer_norm_ref(x, a, b):
    mean = jnp.mean(x, axis=-1, keepdims=True)
    d = x.shape[-1]
    var = jnp.sum((x - mean) ** 2, axis=-1, keepdims=True) / (d - 1)
    std = jnp.sqrt(var)
    return a * (x - mean) / (std + EPS) + b


def _mha_ref(xq, xkv, mask, w, b):
    q = xq @ w[0] + b[0]
    k = xkv @ w[1] + b[1]
    v = xkv @ w[2] + b[2]
    scale = 1.0 / math.sqrt(D_K)
    outs = []
    for h in range(N_HEADS):
        sl = slice(h * D_K, (h + 1) * D_K)
        s = (q[:, sl] @ k[:, sl].T) * scale
        s = jnp.where(mask == 0.0, -1e9, s)
        p = jax.nn.softmax(s, axis=-1)
        outs.append(p @ v[:, sl])
    o = jnp.concatenate(outs, axis=-1)
    return o @ w[3] + b[3]


def _decoder_layer_ref_2d(x, m, tgt_mask, src_mask, p):
    xn = _layer_norm_ref(x, p["ln_a"][0], p["ln_b"][0])
    x = x + _mha_ref(xn, xn, tgt_mask, p["w_self"], p["b_self"])
    xn = _layer_norm_ref(x, p["ln_a"][1], p["ln_b"][1])
    x = x + _mha_ref(xn, m, src_mask, p["w_src"], p["b_src"])
    xn = _layer_norm_ref(x, p["ln_a"][2], p["ln_b"][2])
    h = jnp.maximum(xn @ p["ff_w1"] + p["ff_b1"][0], 0.0)
    return x + h @ p["ff_w2"] + p["ff_b2"][0]


def decoder_layer_ref(x, memory, src_mask, tgt_mask, raw):
    fn = lambda xb, mb, tm, sm: _decoder_layer_ref_2d(xb, mb, tm, sm, raw)
    return jax.vmap(fn)(x, memory, tgt_mask, src_mask)


if __name__ == "__main__":
    B, T, S, D = 2, 8, 8, D_MODEL
    key = jax.random.PRNGKey(0)
    ks = jax.random.split(key, 12)

    x = jax.random.normal(ks[0], (B, T, D), jnp.float32)
    memory = jax.random.normal(ks[1], (B, S, D), jnp.float32)

    # causal target mask; source mask masks the last 2 positions of batch 1
    tgt_mask = jnp.tril(jnp.ones((T, T), jnp.float32))[None].repeat(B, 0)
    src_mask = jnp.ones((B, T, S), jnp.float32)
    src_mask = src_mask.at[1, :, -2:].set(0.0)

    sc = 0.1
    raw = {
        "w_self": sc * jax.random.normal(ks[2], (4, D, D), jnp.float32),
        "b_self": sc * jax.random.normal(ks[3], (4, D), jnp.float32),
        "w_src":  sc * jax.random.normal(ks[4], (4, D, D), jnp.float32),
        "b_src":  sc * jax.random.normal(ks[5], (4, D), jnp.float32),
        "ff_w1":  sc * jax.random.normal(ks[6], (D, D_FF), jnp.float32),
        "ff_b1":  sc * jax.random.normal(ks[7], (1, D_FF), jnp.float32),
        "ff_w2":  sc * jax.random.normal(ks[8], (D_FF, D), jnp.float32),
        "ff_b2":  sc * jax.random.normal(ks[9], (1, D), jnp.float32),
        "ln_a":   jnp.ones((3, D), jnp.float32),
        "ln_b":   jnp.zeros((3, D), jnp.float32),
    }
    params = pack_params(raw)

    out = decoder_layer_pallas(x, memory, src_mask, tgt_mask, params)
    out = jax.block_until_ready(out)

    ref = decoder_layer_ref(x, memory, src_mask, tgt_mask, raw)
    assert out.shape == (B, T, D)
    # bf16 MXU operands (f32 accumulation) => ~4e-3 relative quantization per
    # element; validate against the f32 reference with a 2e-2 tolerance.
    assert jnp.allclose(out, ref, rtol=2e-2, atol=2e-2), "mismatch vs reference"

    print("KERNEL_OK")
</pallas_src>

<mosaic_0001>
module attributes {stable_mosaic.version = 11 : i64} {
  func.func @decoder_layer_kernel(%arg0: memref<16x32xf32, #tpu.memory_space<vmem>>, %arg1: memref<16x32xbf16, #tpu.memory_space<vmem>>, %arg2: memref<8x8x8xf32, #tpu.memory_space<vmem>>, %arg3: memref<8x8x8xf32, #tpu.memory_space<vmem>>, %arg4: memref<32x96xbf16, #tpu.memory_space<vmem>>, %arg5: memref<1x96xf32, #tpu.memory_space<vmem>>, %arg6: memref<32x32xbf16, #tpu.memory_space<vmem>>, %arg7: memref<1x32xf32, #tpu.memory_space<vmem>>, %arg8: memref<32x32xbf16, #tpu.memory_space<vmem>>, %arg9: memref<1x32xf32, #tpu.memory_space<vmem>>, %arg10: memref<32x64xbf16, #tpu.memory_space<vmem>>, %arg11: memref<1x64xf32, #tpu.memory_space<vmem>>, %arg12: memref<32x32xbf16, #tpu.memory_space<vmem>>, %arg13: memref<1x32xf32, #tpu.memory_space<vmem>>, %arg14: memref<32x64xbf16, #tpu.memory_space<vmem>>, %arg15: memref<1x64xf32, #tpu.memory_space<vmem>>, %arg16: memref<64x32xbf16, #tpu.memory_space<vmem>>, %arg17: memref<1x32xf32, #tpu.memory_space<vmem>>, %arg18: memref<3x32xf32, #tpu.memory_space<vmem>>, %arg19: memref<3x32xf32, #tpu.memory_space<vmem>>, %arg20: memref<16x32xf32, #tpu.memory_space<vmem>>) attributes {dimension_semantics = [], scalar_prefetch = 0 : i64, scratch_operands = 0 : i64, tpu.core_type = #tpu.core_type<tc>} {
    %c0 = arith.constant 0 : index
    %c0_0 = arith.constant 0 : index
    %0 = vector.load %arg0[%c0, %c0_0] : memref<16x32xf32, #tpu.memory_space<vmem>>, vector<16x32xf32>
    %c0_1 = arith.constant 0 : index
    %c0_2 = arith.constant 0 : index
    %1 = vector.load %arg1[%c0_1, %c0_2] : memref<16x32xbf16, #tpu.memory_space<vmem>>, vector<16x32xbf16>
    %c0_3 = arith.constant 0 : index
    %c0_4 = arith.constant 0 : index
    %2 = vector.load %arg18[%c0_3, %c0_4] : memref<3x32xf32, #tpu.memory_space<vmem>>, vector<3x32xf32>
    %c0_5 = arith.constant 0 : index
    %c0_6 = arith.constant 0 : index
    %3 = vector.load %arg19[%c0_5, %c0_6] : memref<3x32xf32, #tpu.memory_space<vmem>>, vector<3x32xf32>
    %4 = vector.extract_strided_slice %2 {offsets = [0, 0], sizes = [1, 32], strides = [1, 1]} : vector<3x32xf32> to vector<1x32xf32>
    %5 = vector.extract_strided_slice %3 {offsets = [0, 0], sizes = [1, 32], strides = [1, 1]} : vector<3x32xf32> to vector<1x32xf32>
    %cst = arith.constant dense<0.000000e+00> : vector<16xf32>
    %6 = vector.multi_reduction <add>, %0, %cst [1] : vector<16x32xf32> to vector<16xf32>
    %7 = vector.shape_cast %6 : vector<16xf32> to vector<16x1xf32>
    %cst_7 = arith.constant 3.200000e+01 : f32
    %8 = vector.broadcast %cst_7 : f32 to vector<16x1xf32>
    %9 = arith.divf %7, %8 : vector<16x1xf32>
    %10 = vector.broadcast %9 : vector<16x1xf32> to vector<16x32xf32>
    %11 = arith.subf %0, %10 : vector<16x32xf32>
    %12 = arith.mulf %11, %11 : vector<16x32xf32>
    %cst_8 = arith.constant dense<0.000000e+00> : vector<16xf32>
    %13 = vector.multi_reduction <add>, %12, %cst_8 [1] : vector<16x32xf32> to vector<16xf32>
    %14 = vector.shape_cast %13 : vector<16xf32> to vector<16x1xf32>
    %cst_9 = arith.constant 3.100000e+01 : f32
    %15 = vector.broadcast %cst_9 : f32 to vector<16x1xf32>
    %16 = arith.divf %14, %15 : vector<16x1xf32>
    %17 = math.sqrt %16 : vector<16x1xf32>
    %18 = vector.broadcast %9 : vector<16x1xf32> to vector<16x32xf32>
    %19 = arith.subf %0, %18 : vector<16x32xf32>
    %20 = vector.broadcast %4 : vector<1x32xf32> to vector<16x32xf32>
    %21 = arith.mulf %20, %19 : vector<16x32xf32>
    %cst_10 = arith.constant 9.99999997E-7 : f32
    %22 = vector.broadcast %cst_10 : f32 to vector<16x1xf32>
    %23 = arith.addf %17, %22 : vector<16x1xf32>
    %24 = vector.broadcast %23 : vector<16x1xf32> to vector<16x32xf32>
    %25 = arith.divf %21, %24 : vector<16x32xf32>
    %26 = vector.broadcast %5 : vector<1x32xf32> to vector<16x32xf32>
    %27 = arith.addf %25, %26 : vector<16x32xf32>
    %28 = arith.truncf %27 : vector<16x32xf32> to vector<16x32xbf16>
    %c0_11 = arith.constant 0 : index
    %c0_12 = arith.constant 0 : index
    %29 = vector.load %arg4[%c0_11, %c0_12] : memref<32x96xbf16, #tpu.memory_space<vmem>>, vector<32x96xbf16>
    %cst_13 = arith.constant dense<0.000000e+00> : vector<16x96xf32>
    %30 = tpu.matmul %28, %29, %cst_13 {dimension_numbers = #tpu.dot_dimension_numbers<[1], [0], [0], [1], [0, 0, 1, 1], [], []>} : vector<16x32xbf16>, vector<32x96xbf16>, vector<16x96xf32> -> vector<16x96xf32>
    %c0_14 = arith.constant 0 : index
    %c0_15 = arith.constant 0 : index
    %31 = vector.load %arg5[%c0_14, %c0_15] : memref<1x96xf32, #tpu.memory_space<vmem>>, vector<1x96xf32>
    %32 = vector.broadcast %31 : vector<1x96xf32> to vector<16x96xf32>
    %33 = arith.addf %30, %32 : vector<16x96xf32>
    %34 = vector.extract_strided_slice %33 {offsets = [0, 0], sizes = [16, 8], strides = [1, 1]} : vector<16x96xf32> to vector<16x8xf32>
    %35 = vector.shape_cast %34 : vector<16x8xf32> to vector<2x8x8xf32>
    %36 = vector.extract_strided_slice %33 {offsets = [0, 8], sizes = [16, 8], strides = [1, 1]} : vector<16x96xf32> to vector<16x8xf32>
    %37 = vector.shape_cast %36 : vector<16x8xf32> to vector<2x8x8xf32>
    %38 = vector.extract_strided_slice %33 {offsets = [0, 16], sizes = [16, 8], strides = [1, 1]} : vector<16x96xf32> to vector<16x8xf32>
    %39 = vector.shape_cast %38 : vector<16x8xf32> to vector<2x8x8xf32>
    %40 = vector.extract_strided_slice %33 {offsets = [0, 24], sizes = [16, 8], strides = [1, 1]} : vector<16x96xf32> to vector<16x8xf32>
    %41 = vector.shape_cast %40 : vector<16x8xf32> to vector<2x8x8xf32>
    %42 = tpu.concatenate %35, %37, %39, %41 in 0 : vector<2x8x8xf32>, vector<2x8x8xf32>, vector<2x8x8xf32>, vector<2x8x8xf32> -> vector<8x8x8xf32>
    %43 = arith.truncf %42 : vector<8x8x8xf32> to vector<8x8x8xbf16>
    %44 = vector.extract_strided_slice %33 {offsets = [0, 32], sizes = [16, 8], strides = [1, 1]} : vector<16x96xf32> to vector<16x8xf32>
    %45 = vector.shape_cast %44 : vector<16x8xf32> to vector<2x8x8xf32>
    %46 = vector.extract_strided_slice %33 {offsets = [0, 40], sizes = [16, 8], strides = [1, 1]} : vector<16x96xf32> to vector<16x8xf32>
    %47 = vector.shape_cast %46 : vector<16x8xf32> to vector<2x8x8xf32>
    %48 = vector.extract_strided_slice %33 {offsets = [0, 48], sizes = [16, 8], strides = [1, 1]} : vector<16x96xf32> to vector<16x8xf32>
    %49 = vector.shape_cast %48 : vector<16x8xf32> to vector<2x8x8xf32>
    %50 = vector.extract_strided_slice %33 {offsets = [0, 56], sizes = [16, 8], strides = [1, 1]} : vector<16x96xf32> to vector<16x8xf32>
    %51 = vector.shape_cast %50 : vector<16x8xf32> to vector<2x8x8xf32>
    %52 = tpu.concatenate %45, %47, %49, %51 in 0 : vector<2x8x8xf32>, vector<2x8x8xf32>, vector<2x8x8xf32>, vector<2x8x8xf32> -> vector<8x8x8xf32>
    %53 = arith.truncf %52 : vector<8x8x8xf32> to vector<8x8x8xbf16>
    %54 = vector.extract_strided_slice %33 {offsets = [0, 64], sizes = [16, 8], strides = [1, 1]} : vector<16x96xf32> to vector<16x8xf32>
    %55 = vector.shape_cast %54 : vector<16x8xf32> to vector<2x8x8xf32>
    %56 = vector.extract_strided_slice %33 {offsets = [0, 72], sizes = [16, 8], strides = [1, 1]} : vector<16x96xf32> to vector<16x8xf32>
    %57 = vector.shape_cast %56 : vector<16x8xf32> to vector<2x8x8xf32>
    %58 = vector.extract_strided_slice %33 {offsets = [0, 80], sizes = [16, 8], strides = [1, 1]} : vector<16x96xf32> to vector<16x8xf32>
    %59 = vector.shape_cast %58 : vector<16x8xf32> to vector<2x8x8xf32>
    %60 = vector.extract_strided_slice %33 {offsets = [0, 88], sizes = [16, 8], strides = [1, 1]} : vector<16x96xf32> to vector<16x8xf32>
    %61 = vector.shape_cast %60 : vector<16x8xf32> to vector<2x8x8xf32>
    %62 = tpu.concatenate %55, %57, %59, %61 in 0 : vector<2x8x8xf32>, vector<2x8x8xf32>, vector<2x8x8xf32>, vector<2x8x8xf32> -> vector<8x8x8xf32>
    %63 = arith.truncf %62 : vector<8x8x8xf32> to vector<8x8x8xbf16>
    %c0_16 = arith.constant 0 : index
    %c0_17 = arith.constant 0 : index
    %c0_18 = arith.constant 0 : index
    %64 = vector.load %arg2[%c0_16, %c0_17, %c0_18] : memref<8x8x8xf32, #tpu.memory_space<vmem>>, vector<8x8x8xf32>
    "tpu.trace_start"() <{level = 10 : i32, message = "nqd,nkd->nqk"}> : () -> ()
    %cst_19 = arith.constant dense<0.000000e+00> : vector<8x8x8xf32>
    %65 = tpu.matmul %43, %53, %cst_19 {dimension_numbers = #tpu.dot_dimension_numbers<[2], [2], [1], [1], [0, 0, 0, 1, 1, 1], [0], [0]>} : vector<8x8x8xbf16>, vector<8x8x8xbf16>, vector<8x8x8xf32> -> vector<8x8x8xf32>
    "tpu.trace_stop"() : () -> ()
    %66 = arith.addf %65, %64 : vector<8x8x8xf32>
    %cst_20 = arith.constant dense<0xFF800000> : vector<8x8xf32>
    %67 = vector.multi_reduction <maximumf>, %66, %cst_20 [2] : vector<8x8x8xf32> to vector<8x8xf32>
    %68 = vector.shape_cast %67 : vector<8x8xf32> to vector<8x8x1xf32>
    %69 = vector.broadcast %68 : vector<8x8x1xf32> to vector<8x8x8xf32>
    %70 = arith.subf %66, %69 : vector<8x8x8xf32>
    %71 = math.exp %70 : vector<8x8x8xf32>
    %cst_21 = arith.constant dense<0.000000e+00> : vector<8x8xf32>
    %72 = vector.multi_reduction <add>, %71, %cst_21 [2] : vector<8x8x8xf32> to vector<8x8xf32>
    %73 = vector.shape_cast %72 : vector<8x8xf32> to vector<8x8x1xf32>
    %74 = tpu.reciprocal %73 {approx = true} : vector<8x8x1xf32> -> vector<8x8x1xf32>
    %75 = vector.broadcast %74 : vector<8x8x1xf32> to vector<8x8x8xf32>
    %76 = arith.mulf %71, %75 : vector<8x8x8xf32>
    %77 = arith.truncf %76 : vector<8x8x8xf32> to vector<8x8x8xbf16>
    "tpu.trace_start"() <{level = 10 : i32, message = "nqk,nkd->nqd"}> : () -> ()
    %cst_22 = arith.constant dense<0.000000e+00> : vector<8x8x8xf32>
    %78 = tpu.matmul %77, %63, %cst_22 {dimension_numbers = #tpu.dot_dimension_numbers<[2], [1], [1], [2], [0, 0, 0, 1, 1, 2], [0], [0]>} : vector<8x8x8xbf16>, vector<8x8x8xbf16>, vector<8x8x8xf32> -> vector<8x8x8xf32>
    "tpu.trace_stop"() : () -> ()
    %79 = vector.extract_strided_slice %78 {offsets = [0, 0, 0], sizes = [2, 8, 8], strides = [1, 1, 1]} : vector<8x8x8xf32> to vector<2x8x8xf32>
    %80 = vector.shape_cast %79 : vector<2x8x8xf32> to vector<16x8xf32>
    %81 = vector.extract_strided_slice %78 {offsets = [2, 0, 0], sizes = [2, 8, 8], strides = [1, 1, 1]} : vector<8x8x8xf32> to vector<2x8x8xf32>
    %82 = vector.shape_cast %81 : vector<2x8x8xf32> to vector<16x8xf32>
    %83 = vector.extract_strided_slice %78 {offsets = [4, 0, 0], sizes = [2, 8, 8], strides = [1, 1, 1]} : vector<8x8x8xf32> to vector<2x8x8xf32>
    %84 = vector.shape_cast %83 : vector<2x8x8xf32> to vector<16x8xf32>
    %85 = vector.extract_strided_slice %78 {offsets = [6, 0, 0], sizes = [2, 8, 8], strides = [1, 1, 1]} : vector<8x8x8xf32> to vector<2x8x8xf32>
    %86 = vector.shape_cast %85 : vector<2x8x8xf32> to vector<16x8xf32>
    %87 = tpu.concatenate %80, %82, %84, %86 in 1 : vector<16x8xf32>, vector<16x8xf32>, vector<16x8xf32>, vector<16x8xf32> -> vector<16x32xf32>
    %88 = arith.truncf %87 : vector<16x32xf32> to vector<16x32xbf16>
    %c0_23 = arith.constant 0 : index
    %c0_24 = arith.constant 0 : index
    %89 = vector.load %arg6[%c0_23, %c0_24] : memref<32x32xbf16, #tpu.memory_space<vmem>>, vector<32x32xbf16>
    %cst_25 = arith.constant dense<0.000000e+00> : vector<16x32xf32>
    %90 = tpu.matmul %88, %89, %cst_25 {dimension_numbers = #tpu.dot_dimension_numbers<[1], [0], [0], [1], [0, 0, 1, 1], [], []>} : vector<16x32xbf16>, vector<32x32xbf16>, vector<16x32xf32> -> vector<16x32xf32>
    %c0_26 = arith.constant 0 : index
    %c0_27 = arith.constant 0 : index
    %91 = vector.load %arg7[%c0_26, %c0_27] : memref<1x32xf32, #tpu.memory_space<vmem>>, vector<1x32xf32>
    %92 = vector.broadcast %91 : vector<1x32xf32> to vector<16x32xf32>
    %93 = arith.addf %90, %92 : vector<16x32xf32>
    %94 = arith.addf %0, %93 : vector<16x32xf32>
    %95 = vector.extract_strided_slice %2 {offsets = [1, 0], sizes = [1, 32], strides = [1, 1]} : vector<3x32xf32> to vector<1x32xf32>
    %96 = vector.extract_strided_slice %3 {offsets = [1, 0], sizes = [1, 32], strides = [1, 1]} : vector<3x32xf32> to vector<1x32xf32>
    %cst_28 = arith.constant dense<0.000000e+00> : vector<16xf32>
    %97 = vector.multi_reduction <add>, %94, %cst_28 [1] : vector<16x32xf32> to vector<16xf32>
    %98 = vector.shape_cast %97 : vector<16xf32> to vector<16x1xf32>
    %cst_29 = arith.constant 3.200000e+01 : f32
    %99 = vector.broadcast %cst_29 : f32 to vector<16x1xf32>
    %100 = arith.divf %98, %99 : vector<16x1xf32>
    %101 = vector.broadcast %100 : vector<16x1xf32> to vector<16x32xf32>
    %102 = arith.subf %94, %101 : vector<16x32xf32>
    %103 = arith.mulf %102, %102 : vector<16x32xf32>
    %cst_30 = arith.constant dense<0.000000e+00> : vector<16xf32>
    %104 = vector.multi_reduction <add>, %103, %cst_30 [1] : vector<16x32xf32> to vector<16xf32>
    %105 = vector.shape_cast %104 : vector<16xf32> to vector<16x1xf32>
    %cst_31 = arith.constant 3.100000e+01 : f32
    %106 = vector.broadcast %cst_31 : f32 to vector<16x1xf32>
    %107 = arith.divf %105, %106 : vector<16x1xf32>
    %108 = math.sqrt %107 : vector<16x1xf32>
    %109 = vector.broadcast %100 : vector<16x1xf32> to vector<16x32xf32>
    %110 = arith.subf %94, %109 : vector<16x32xf32>
    %111 = vector.broadcast %95 : vector<1x32xf32> to vector<16x32xf32>
    %112 = arith.mulf %111, %110 : vector<16x32xf32>
    %cst_32 = arith.constant 9.99999997E-7 : f32
    %113 = vector.broadcast %cst_32 : f32 to vector<16x1xf32>
    %114 = arith.addf %108, %113 : vector<16x1xf32>
    %115 = vector.broadcast %114 : vector<16x1xf32> to vector<16x32xf32>
    %116 = arith.divf %112, %115 : vector<16x32xf32>
    %117 = vector.broadcast %96 : vector<1x32xf32> to vector<16x32xf32>
    %118 = arith.addf %116, %117 : vector<16x32xf32>
    %119 = arith.truncf %118 : vector<16x32xf32> to vector<16x32xbf16>
    %c0_33 = arith.constant 0 : index
    %c0_34 = arith.constant 0 : index
    %120 = vector.load %arg8[%c0_33, %c0_34] : memref<32x32xbf16, #tpu.memory_space<vmem>>, vector<32x32xbf16>
    %cst_35 = arith.constant dense<0.000000e+00> : vector<16x32xf32>
    %121 = tpu.matmul %119, %120, %cst_35 {dimension_numbers = #tpu.dot_dimension_numbers<[1], [0], [0], [1], [0, 0, 1, 1], [], []>} : vector<16x32xbf16>, vector<32x32xbf16>, vector<16x32xf32> -> vector<16x32xf32>
    %c0_36 = arith.constant 0 : index
    %c0_37 = arith.constant 0 : index
    %122 = vector.load %arg9[%c0_36, %c0_37] : memref<1x32xf32, #tpu.memory_space<vmem>>, vector<1x32xf32>
    %123 = vector.broadcast %122 : vector<1x32xf32> to vector<16x32xf32>
    %124 = arith.addf %121, %123 : vector<16x32xf32>
    %c0_38 = arith.constant 0 : index
    %c0_39 = arith.constant 0 : index
    %125 = vector.load %arg10[%c0_38, %c0_39] : memref<32x64xbf16, #tpu.memory_space<vmem>>, vector<32x64xbf16>
    %cst_40 = arith.constant dense<0.000000e+00> : vector<16x64xf32>
    %126 = tpu.matmul %1, %125, %cst_40 {dimension_numbers = #tpu.dot_dimension_numbers<[1], [0], [0], [1], [0, 0, 1, 1], [], []>} : vector<16x32xbf16>, vector<32x64xbf16>, vector<16x64xf32> -> vector<16x64xf32>
    %c0_41 = arith.constant 0 : index
    %c0_42 = arith.constant 0 : index
    %127 = vector.load %arg11[%c0_41, %c0_42] : memref<1x64xf32, #tpu.memory_space<vmem>>, vector<1x64xf32>
    %128 = vector.broadcast %127 : vector<1x64xf32> to vector<16x64xf32>
    %129 = arith.addf %126, %128 : vector<16x64xf32>
    %130 = vector.extract_strided_slice %124 {offsets = [0, 0], sizes = [16, 8], strides = [1, 1]} : vector<16x32xf32> to vector<16x8xf32>
    %131 = vector.shape_cast %130 : vector<16x8xf32> to vector<2x8x8xf32>
    %132 = vector.extract_strided_slice %124 {offsets = [0, 8], sizes = [16, 8], strides = [1, 1]} : vector<16x32xf32> to vector<16x8xf32>
    %133 = vector.shape_cast %132 : vector<16x8xf32> to vector<2x8x8xf32>
    %134 = vector.extract_strided_slice %124 {offsets = [0, 16], sizes = [16, 8], strides = [1, 1]} : vector<16x32xf32> to vector<16x8xf32>
    %135 = vector.shape_cast %134 : vector<16x8xf32> to vector<2x8x8xf32>
    %136 = vector.extract_strided_slice %124 {offsets = [0, 24], sizes = [16, 8], strides = [1, 1]} : vector<16x32xf32> to vector<16x8xf32>
    %137 = vector.shape_cast %136 : vector<16x8xf32> to vector<2x8x8xf32>
    %138 = tpu.concatenate %131, %133, %135, %137 in 0 : vector<2x8x8xf32>, vector<2x8x8xf32>, vector<2x8x8xf32>, vector<2x8x8xf32> -> vector<8x8x8xf32>
    %139 = arith.truncf %138 : vector<8x8x8xf32> to vector<8x8x8xbf16>
    %140 = vector.extract_strided_slice %129 {offsets = [0, 0], sizes = [16, 8], strides = [1, 1]} : vector<16x64xf32> to vector<16x8xf32>
    %141 = vector.shape_cast %140 : vector<16x8xf32> to vector<2x8x8xf32>
    %142 = vector.extract_strided_slice %129 {offsets = [0, 8], sizes = [16, 8], strides = [1, 1]} : vector<16x64xf32> to vector<16x8xf32>
    %143 = vector.shape_cast %142 : vector<16x8xf32> to vector<2x8x8xf32>
    %144 = vector.extract_strided_slice %129 {offsets = [0, 16], sizes = [16, 8], strides = [1, 1]} : vector<16x64xf32> to vector<16x8xf32>
    %145 = vector.shape_cast %144 : vector<16x8xf32> to vector<2x8x8xf32>
    %146 = vector.extract_strided_slice %129 {offsets = [0, 24], sizes = [16, 8], strides = [1, 1]} : vector<16x64xf32> to vector<16x8xf32>
    %147 = vector.shape_cast %146 : vector<16x8xf32> to vector<2x8x8xf32>
    %148 = tpu.concatenate %141, %143, %145, %147 in 0 : vector<2x8x8xf32>, vector<2x8x8xf32>, vector<2x8x8xf32>, vector<2x8x8xf32> -> vector<8x8x8xf32>
    %149 = arith.truncf %148 : vector<8x8x8xf32> to vector<8x8x8xbf16>
    %150 = vector.extract_strided_slice %129 {offsets = [0, 32], sizes = [16, 8], strides = [1, 1]} : vector<16x64xf32> to vector<16x8xf32>
    %151 = vector.shape_cast %150 : vector<16x8xf32> to vector<2x8x8xf32>
    %152 = vector.extract_strided_slice %129 {offsets = [0, 40], sizes = [16, 8], strides = [1, 1]} : vector<16x64xf32> to vector<16x8xf32>
    %153 = vector.shape_cast %152 : vector<16x8xf32> to vector<2x8x8xf32>
    %154 = vector.extract_strided_slice %129 {offsets = [0, 48], sizes = [16, 8], strides = [1, 1]} : vector<16x64xf32> to vector<16x8xf32>
    %155 = vector.shape_cast %154 : vector<16x8xf32> to vector<2x8x8xf32>
    %156 = vector.extract_strided_slice %129 {offsets = [0, 56], sizes = [16, 8], strides = [1, 1]} : vector<16x64xf32> to vector<16x8xf32>
    %157 = vector.shape_cast %156 : vector<16x8xf32> to vector<2x8x8xf32>
    %158 = tpu.concatenate %151, %153, %155, %157 in 0 : vector<2x8x8xf32>, vector<2x8x8xf32>, vector<2x8x8xf32>, vector<2x8x8xf32> -> vector<8x8x8xf32>
    %159 = arith.truncf %158 : vector<8x8x8xf32> to vector<8x8x8xbf16>
    %c0_43 = arith.constant 0 : index
    %c0_44 = arith.constant 0 : index
    %c0_45 = arith.constant 0 : index
    %160 = vector.load %arg3[%c0_43, %c0_44, %c0_45] : memref<8x8x8xf32, #tpu.memory_space<vmem>>, vector<8x8x8xf32>
    "tpu.trace_start"() <{level = 10 : i32, message = "nqd,nkd->nqk"}> : () -> ()
    %cst_46 = arith.constant dense<0.000000e+00> : vector<8x8x8xf32>
    %161 = tpu.matmul %139, %149, %cst_46 {dimension_numbers = #tpu.dot_dimension_numbers<[2], [2], [1], [1], [0, 0, 0, 1, 1, 1], [0], [0]>} : vector<8x8x8xbf16>, vector<8x8x8xbf16>, vector<8x8x8xf32> -> vector<8x8x8xf32>
    "tpu.trace_stop"() : () -> ()
    %162 = arith.addf %161, %160 : vector<8x8x8xf32>
    %cst_47 = arith.constant dense<0xFF800000> : vector<8x8xf32>
    %163 = vector.multi_reduction <maximumf>, %162, %cst_47 [2] : vector<8x8x8xf32> to vector<8x8xf32>
    %164 = vector.shape_cast %163 : vector<8x8xf32> to vector<8x8x1xf32>
    %165 = vector.broadcast %164 : vector<8x8x1xf32> to vector<8x8x8xf32>
    %166 = arith.subf %162, %165 : vector<8x8x8xf32>
    %167 = math.exp %166 : vector<8x8x8xf32>
    %cst_48 = arith.constant dense<0.000000e+00> : vector<8x8xf32>
    %168 = vector.multi_reduction <add>, %167, %cst_48 [2] : vector<8x8x8xf32> to vector<8x8xf32>
    %169 = vector.shape_cast %168 : vector<8x8xf32> to vector<8x8x1xf32>
    %170 = tpu.reciprocal %169 {approx = true} : vector<8x8x1xf32> -> vector<8x8x1xf32>
    %171 = vector.broadcast %170 : vector<8x8x1xf32> to vector<8x8x8xf32>
    %172 = arith.mulf %167, %171 : vector<8x8x8xf32>
    %173 = arith.truncf %172 : vector<8x8x8xf32> to vector<8x8x8xbf16>
    "tpu.trace_start"() <{level = 10 : i32, message = "nqk,nkd->nqd"}> : () -> ()
    %cst_49 = arith.constant dense<0.000000e+00> : vector<8x8x8xf32>
    %174 = tpu.matmul %173, %159, %cst_49 {dimension_numbers = #tpu.dot_dimension_numbers<[2], [1], [1], [2], [0, 0, 0, 1, 1, 2], [0], [0]>} : vector<8x8x8xbf16>, vector<8x8x8xbf16>, vector<8x8x8xf32> -> vector<8x8x8xf32>
    "tpu.trace_stop"() : () -> ()
    %175 = vector.extract_strided_slice %174 {offsets = [0, 0, 0], sizes = [2, 8, 8], strides = [1, 1, 1]} : vector<8x8x8xf32> to vector<2x8x8xf32>
    %176 = vector.shape_cast %175 : vector<2x8x8xf32> to vector<16x8xf32>
    %177 = vector.extract_strided_slice %174 {offsets = [2, 0, 0], sizes = [2, 8, 8], strides = [1, 1, 1]} : vector<8x8x8xf32> to vector<2x8x8xf32>
    %178 = vector.shape_cast %177 : vector<2x8x8xf32> to vector<16x8xf32>
    %179 = vector.extract_strided_slice %174 {offsets = [4, 0, 0], sizes = [2, 8, 8], strides = [1, 1, 1]} : vector<8x8x8xf32> to vector<2x8x8xf32>
    %180 = vector.shape_cast %179 : vector<2x8x8xf32> to vector<16x8xf32>
    %181 = vector.extract_strided_slice %174 {offsets = [6, 0, 0], sizes = [2, 8, 8], strides = [1, 1, 1]} : vector<8x8x8xf32> to vector<2x8x8xf32>
    %182 = vector.shape_cast %181 : vector<2x8x8xf32> to vector<16x8xf32>
    %183 = tpu.concatenate %176, %178, %180, %182 in 1 : vector<16x8xf32>, vector<16x8xf32>, vector<16x8xf32>, vector<16x8xf32> -> vector<16x32xf32>
    %184 = arith.truncf %183 : vector<16x32xf32> to vector<16x32xbf16>
    %c0_50 = arith.constant 0 : index
    %c0_51 = arith.constant 0 : index
    %185 = vector.load %arg12[%c0_50, %c0_51] : memref<32x32xbf16, #tpu.memory_space<vmem>>, vector<32x32xbf16>
    %cst_52 = arith.constant dense<0.000000e+00> : vector<16x32xf32>
    %186 = tpu.matmul %184, %185, %cst_52 {dimension_numbers = #tpu.dot_dimension_numbers<[1], [0], [0], [1], [0, 0, 1, 1], [], []>} : vector<16x32xbf16>, vector<32x32xbf16>, vector<16x32xf32> -> vector<16x32xf32>
    %c0_53 = arith.constant 0 : index
    %c0_54 = arith.constant 0 : index
    %187 = vector.load %arg13[%c0_53, %c0_54] : memref<1x32xf32, #tpu.memory_space<vmem>>, vector<1x32xf32>
    %188 = vector.broadcast %187 : vector<1x32xf32> to vector<16x32xf32>
    %189 = arith.addf %186, %188 : vector<16x32xf32>
    %190 = arith.addf %94, %189 : vector<16x32xf32>
    %191 = vector.extract_strided_slice %2 {offsets = [2, 0], sizes = [1, 32], strides = [1, 1]} : vector<3x32xf32> to vector<1x32xf32>
    %192 = vector.extract_strided_slice %3 {offsets = [2, 0], sizes = [1, 32], strides = [1, 1]} : vector<3x32xf32> to vector<1x32xf32>
    %cst_55 = arith.constant dense<0.000000e+00> : vector<16xf32>
    %193 = vector.multi_reduction <add>, %190, %cst_55 [1] : vector<16x32xf32> to vector<16xf32>
    %194 = vector.shape_cast %193 : vector<16xf32> to vector<16x1xf32>
    %cst_56 = arith.constant 3.200000e+01 : f32
    %195 = vector.broadcast %cst_56 : f32 to vector<16x1xf32>
    %196 = arith.divf %194, %195 : vector<16x1xf32>
    %197 = vector.broadcast %196 : vector<16x1xf32> to vector<16x32xf32>
    %198 = arith.subf %190, %197 : vector<16x32xf32>
    %199 = arith.mulf %198, %198 : vector<16x32xf32>
    %cst_57 = arith.constant dense<0.000000e+00> : vector<16xf32>
    %200 = vector.multi_reduction <add>, %199, %cst_57 [1] : vector<16x32xf32> to vector<16xf32>
    %201 = vector.shape_cast %200 : vector<16xf32> to vector<16x1xf32>
    %cst_58 = arith.constant 3.100000e+01 : f32
    %202 = vector.broadcast %cst_58 : f32 to vector<16x1xf32>
    %203 = arith.divf %201, %202 : vector<16x1xf32>
    %204 = math.sqrt %203 : vector<16x1xf32>
    %205 = vector.broadcast %196 : vector<16x1xf32> to vector<16x32xf32>
    %206 = arith.subf %190, %205 : vector<16x32xf32>
    %207 = vector.broadcast %191 : vector<1x32xf32> to vector<16x32xf32>
    %208 = arith.mulf %207, %206 : vector<16x32xf32>
    %cst_59 = arith.constant 9.99999997E-7 : f32
    %209 = vector.broadcast %cst_59 : f32 to vector<16x1xf32>
    %210 = arith.addf %204, %209 : vector<16x1xf32>
    %211 = vector.broadcast %210 : vector<16x1xf32> to vector<16x32xf32>
    %212 = arith.divf %208, %211 : vector<16x32xf32>
    %213 = vector.broadcast %192 : vector<1x32xf32> to vector<16x32xf32>
    %214 = arith.addf %212, %213 : vector<16x32xf32>
    %215 = arith.truncf %214 : vector<16x32xf32> to vector<16x32xbf16>
    %c0_60 = arith.constant 0 : index
    %c0_61 = arith.constant 0 : index
    %216 = vector.load %arg14[%c0_60, %c0_61] : memref<32x64xbf16, #tpu.memory_space<vmem>>, vector<32x64xbf16>
    %cst_62 = arith.constant dense<0.000000e+00> : vector<16x64xf32>
    %217 = tpu.matmul %215, %216, %cst_62 {dimension_numbers = #tpu.dot_dimension_numbers<[1], [0], [0], [1], [0, 0, 1, 1], [], []>} : vector<16x32xbf16>, vector<32x64xbf16>, vector<16x64xf32> -> vector<16x64xf32>
    %c0_63 = arith.constant 0 : index
    %c0_64 = arith.constant 0 : index
    %218 = vector.load %arg15[%c0_63, %c0_64] : memref<1x64xf32, #tpu.memory_space<vmem>>, vector<1x64xf32>
    %219 = vector.broadcast %218 : vector<1x64xf32> to vector<16x64xf32>
    %220 = arith.addf %217, %219 : vector<16x64xf32>
    %cst_65 = arith.constant 0.000000e+00 : f32
    %221 = vector.broadcast %cst_65 : f32 to vector<16x64xf32>
    %222 = arith.maximumf %220, %221 : vector<16x64xf32>
    %223 = arith.truncf %222 : vector<16x64xf32> to vector<16x64xbf16>
    %c0_66 = arith.constant 0 : index
    %c0_67 = arith.constant 0 : index
    %224 = vector.load %arg16[%c0_66, %c0_67] : memref<64x32xbf16, #tpu.memory_space<vmem>>, vector<64x32xbf16>
    %cst_68 = arith.constant dense<0.000000e+00> : vector<16x32xf32>
    %225 = tpu.matmul %223, %224, %cst_68 {dimension_numbers = #tpu.dot_dimension_numbers<[1], [0], [0], [1], [0, 0, 1, 1], [], []>} : vector<16x64xbf16>, vector<64x32xbf16>, vector<16x32xf32> -> vector<16x32xf32>
    %c0_69 = arith.constant 0 : index
    %c0_70 = arith.constant 0 : index
    %226 = vector.load %arg17[%c0_69, %c0_70] : memref<1x32xf32, #tpu.memory_space<vmem>>, vector<1x32xf32>
    %227 = vector.broadcast %226 : vector<1x32xf32> to vector<16x32xf32>
    %228 = arith.addf %225, %227 : vector<16x32xf32>
    %229 = arith.addf %190, %228 : vector<16x32xf32>
    %c0_71 = arith.constant 0 : index
    %c0_72 = arith.constant 0 : index
    %230 = vector.load %arg20[%c0_71, %c0_72] : memref<16x32xf32, #tpu.memory_space<vmem>>, vector<16x32xf32>
    tpu.vector_store %arg20[%c0_71, %c0_72], %229 {strides = array<i32>} : memref<16x32xf32, #tpu.memory_space<vmem>>, vector<16x32xf32>,
    return
  }
}

</mosaic_0001>

<bundles_post_ra>
// kernel: tpu_custom_call.1
= control target key start
LH: loop header
LB: loop body
LE: loop exit
PB: predicated region body
PF: predicated region fallthrough
CT: control target
= control target key end

     0   :  { %s3016_s0 = inlined_call_operand.vmem [shape: f32[16,32], index: 0, kind: input, shape index: {}]   ;;  %s3017_s1 = inlined_call_operand.hbm [shape: bf16[16,32], index: 1, kind: input, shape index: {}]   ;;  %s3018_s2 = inlined_call_operand.hbm [shape: f32[8,8,8], index: 2, kind: input, shape index: {}]   ;;  %s3019_s3 = inlined_call_operand.hbm [shape: f32[8,8,8], index: 3, kind: input, shape index: {}]   ;;  %s3020_s4 = inlined_call_operand.vmem [shape: bf16[32,96], index: 4, kind: input, shape index: {}]   ;;  %s3021_s5 = inlined_call_operand.hbm [shape: f32[1,96], index: 5, kind: input, shape index: {}]   ;;  %s3022_s6 = inlined_call_operand.vmem [shape: bf16[32,32], index: 6, kind: input, shape index: {}]   ;;  %s3023_s7 = inlined_call_operand.hbm [shape: f32[1,32], index: 7, kind: input, shape index: {}]   ;;  %s3024_s8 = inlined_call_operand.hbm [shape: bf16[32,32], index: 8, kind: input, shape index: {}]   ;;  %s3025_s9 = inlined_call_operand.hbm [shape: f32[1,32], index: 9, kind: input, shape index: {}]   ;;  %s3026_s10 = inlined_call_operand.hbm [shape: bf16[32,64], index: 10, kind: input, shape index: {}]   ;;  %s3027_s11 = inlined_call_operand.vmem [shape: f32[1,64], index: 11, kind: input, shape index: {}]   ;;  %s3028_s12 = inlined_call_operand.hbm [shape: bf16[32,32], index: 12, kind: input, shape index: {}]   ;;  %s3029_s13 = inlined_call_operand.vmem [shape: f32[1,32], index: 13, kind: input, shape index: {}]   ;;  %s3030_s14 = inlined_call_operand.hbm [shape: bf16[32,64], index: 14, kind: input, shape index: {}]   ;;  %s3031_s15 = inlined_call_operand.vmem [shape: f32[1,64], index: 15, kind: input, shape index: {}]   ;;  %s3032_s16 = inlined_call_operand.vmem [shape: bf16[64,32], index: 16, kind: input, shape index: {}]   ;;  %s3033_s17 = inlined_call_operand.vmem [shape: f32[1,32], index: 17, kind: input, shape index: {}]   ;;  %s3034_s18 = inlined_call_operand.vmem [shape: f32[3,32], index: 18, kind: input, shape index: {}]   ;;  %s3035_s19 = inlined_call_operand.vmem [shape: f32[3,32], index: 19, kind: input, shape index: {}]   ;;  %s3036_s20 = inlined_call_operand.hbm [shape: f32[16,32], index: 20, kind: output, shape index: {}]  }
   0x1   :  { %3039 = sst [smem:[#allocation27_spill]] %s3016_s0 }
   0x2   :  { %3040 = sst [smem:[#allocation28_spill]] %s3017_s1 }
   0x3   :  { %3041 = sst [smem:[#allocation29_spill]] %s3018_s2 }
   0x4   :  { %3042 = sst [smem:[#allocation30_spill]] %s3019_s3 }
   0x5   :  { %3043 = sst [smem:[#allocation31_spill]] %s3020_s4 }
   0x6   :  { %3044 = sst [smem:[#allocation32_spill]] %s3036_s20 }
   0x7   :  { %25 = vsyncpa [#allocation3], 0 }
   0x8   :  { %26 = vsyncpa [#allocation6], 0 }
   0x9   :  { %27 = vsyncpa [#allocation9], 0 }
   0xa   :  { %28 = vsyncpa [#allocation12], 0 }
   0xb   :  { %29 = vsyncpa [#allocation15], 0 }
   0xc   :  { %30 = vsyncpa [#allocation18], 0  ;;  %s3045_s23 = sld [smem:[#allocation29_spill]] }
  0x12   :  { %s51_s24 = sshll.u32 %s3045_s23, 4  ;;  %s52_s24 = int_to_ptr.hbm [resolvable:$true] %s51_s24 }
  0x13   :  { %31 = vsyncpa [#allocation4], 0  ;;  %s2451_s2 = smov [#allocation5]   ;;  %s80_s27 = sshll.u32 %s3021_s5, 4  ;;  %s81_s27 = int_to_ptr.hbm [resolvable:$true] %s80_s27 }
  0x14   :  { %s53_s25 = sshll.u32 %s2451_s2, 4  ;;  %s2452_s28 = smov 128   ;;  %s54_s25 = int_to_ptr.vmem [resolvable:$true] %s53_s25 }
  0x15   :  { %s2453_s4 = smov 8   ;;  %s2454_s29 = smov [#allocation8]  }
  0x16   :  { %59 = dma.hbm_to_vmem [thread:$0]  %s52_s24, 1024, %s54_s25, [#allocation6], %s2452_s28, %s2452_s28, %s2453_s4  }
  0x17   :  { %s82_s30 = sshll.u32 %s2454_s29, 4  ;;  %s103_s1 = sshll.u32 %s3024_s8, 4  ;;  %s83_s30 = int_to_ptr.vmem [resolvable:$true] %s82_s30  ;;  %s104_s1 = int_to_ptr.hbm [resolvable:$true] %s103_s1 }
  0x18   :  { %85 = dma.hbm_to_vmem [thread:$0]  %s81_s27, 16, %s83_s30, [#allocation9]  }
  0x19   :  { %s2455_s22 = smov [#allocation11]   ;;  %s127_s3 = sshll.u32 %s3026_s10, 4  ;;  %s128_s3 = int_to_ptr.hbm [resolvable:$true] %s127_s3 }
  0x1a   :  { %s105_s23 = sshll.u32 %s2455_s22, 4  ;;  %s2456_s26 = smov 64   ;;  %s106_s23 = int_to_ptr.vmem [resolvable:$true] %s105_s23 }
  0x1b   :  { %s2457_s20 = smov 4   ;;  %s2458_s24 = smov [#allocation14]  }
  0x1c   :  { %111 = dma.hbm_to_vmem [thread:$0]  %s104_s1, 256, %s106_s23, [#allocation12], %s2456_s26, %s2456_s26, %s2457_s20  }
  0x1d   :  { %s129_s25 = sshll.u32 %s2458_s24, 4  ;;  %s3046_s8 = sld [smem:[#allocation28_spill]]  ;;  %s130_s25 = int_to_ptr.vmem [resolvable:$true] %s129_s25 }
  0x1e   :  { %135 = dma.hbm_to_vmem [thread:$0]  %s128_s3, 256, %s130_s25, [#allocation15], %s2456_s26, %s2456_s26, %s2457_s20  }
  0x1f   :  { %s3047_s21 = sld [smem:[#allocation30_spill]]  ;;  %s2459_s5 = smov [#allocation2]  }
  0x20   :  { %s40_s2 = sshll.u32 %s2459_s5, 4  ;;  %s2460_s1 = smov [#allocation7]   ;;  %s41_s2 = int_to_ptr.vmem [resolvable:$true] %s40_s2 }
  0x21   :  { %s66_s23 = sshll.u32 %s2460_s1, 4  ;;  %s93_s29 = sshll.u32 %s3023_s7, 4  ;;  %s67_s23 = int_to_ptr.vmem [resolvable:$true] %s66_s23  ;;  %s94_s29 = int_to_ptr.hbm [resolvable:$true] %s93_s29 }
  0x22   :  { %s2461_s10 = smov [#allocation10]   ;;  %s142_s7 = sshll.u32 %s3028_s12, 4  ;;  %s143_s7 = int_to_ptr.hbm [resolvable:$true] %s142_s7 }
  0x23   :  { %s38_s30 = sshll.u32 %s3046_s8, 4  ;;  %s117_s8 = sshll.u32 %s3025_s9, 4  ;;  %s39_s30 = int_to_ptr.hbm [resolvable:$true] %s38_s30  ;;  %s118_s8 = int_to_ptr.hbm [resolvable:$true] %s117_s8 }
  0x24   :  { %46 = dma.hbm_to_vmem [thread:$0]  %s39_s30, 128, %s41_s2, [#allocation3], %s2456_s26, %s2456_s26, %s2457_s20  }
  0x25   :  { %s64_s22 = sshll.u32 %s3047_s21, 4  ;;  %s95_s0 = sshll.u32 %s2461_s10, 4  ;;  %s65_s22 = int_to_ptr.hbm [resolvable:$true] %s64_s22  ;;  %s96_s0 = int_to_ptr.vmem [resolvable:$true] %s95_s0 }
  0x26   :  { %72 = dma.hbm_to_vmem [thread:$0]  %s65_s22, 1024, %s67_s23, [#allocation6], %s2452_s28, %s2452_s28, %s2453_s4  }
  0x27   :  { %98 = dma.hbm_to_vmem [thread:$0]  %s94_s29, 16, %s96_s0, [#allocation9]  }
  0x28   :  { %s2462_s30 = smov [#allocation13]   ;;  %s157_s23 = sshll.u32 %s3030_s14, 4  ;;  %s158_s23 = int_to_ptr.hbm [resolvable:$true] %s157_s23 }
  0x29   :  { %s119_s21 = sshll.u32 %s2462_s30, 4  ;;  %s2463_s24 = smov [#allocation16]   ;;  %s120_s21 = int_to_ptr.vmem [resolvable:$true] %s119_s21 }
  0x2a   :  { %122 = dma.hbm_to_vmem [thread:$0]  %s118_s8, 16, %s120_s21, [#allocation12]  }
  0x2b   :  { %s144_s9 = sshll.u32 %s2463_s24, 4  ;;  %s2464_s27 = smov [#allocation17]   ;;  %s145_s9 = int_to_ptr.vmem [resolvable:$true] %s144_s9 }
  0x2c   :  { %150 = dma.hbm_to_vmem [thread:$0]  %s143_s7, 256, %s145_s9, [#allocation15], %s2456_s26, %s2456_s26, %s2457_s20  }
  0x2d   :  { %s159_s29 = sshll.u32 %s2464_s27, 4  ;;  %s160_s29 = int_to_ptr.vmem [resolvable:$true] %s159_s29 }
  0x2e   :  { %165 = dma.hbm_to_vmem [thread:$0]  %s158_s23, 256, %s160_s29, [#allocation18], %s2456_s26, %s2456_s26, %s2457_s20  }
  0x2f   :  { %2437 = dma.done.wait [#allocation3], 128  }
  0x30   :  { %2438 = vsyncadd [#allocation3], 4294967168 }
  0x31   :  { %2439 = dma.done.wait [#allocation6], 2048  }
  0x32   :  { %2440 = vsyncadd [#allocation6], 4294965248 }
  0x33   :  { %2441 = dma.done.wait [#allocation9], 32  }
  0x34   :  { %2442 = vsyncadd [#allocation9], 4294967264 }
  0x35   :  { %2443 = dma.done.wait [#allocation12], 272  }
  0x36   :  { %2444 = vsyncadd [#allocation12], 4294967024 }
  0x37   :  { %2445 = dma.done.wait [#allocation15], 512  }
  0x38   :  { %2446 = vsyncadd [#allocation15], 4294966784 }
  0x39   :  { %2447 = dma.done.wait [#allocation18], 256  }
  0x3a   :  { %2448 = vsyncadd [#allocation18], 4294967040  ;;  %vm223_vm0 = vcmask 261120   ;;  %s3048_s3 = sld [smem:[#allocation27_spill]]  ;;  %v2465_v4 = vmov 32.0   ;;  %v2466_v21 = vmov 31.0  }
  0x3b   :  { %2079 = vrcp.f32 %v2465_v4  ;;  %s3049_s0 = sld [smem:[#allocation31_spill]]  ;;  %v2673_v62 = vld [vmem:[%s3034_s18] sm:$0x7]  ;;  %s2467_s22 = smov 104   ;;  %vm399_vm15 = vcmask 64512  }
  0x3c   :  { %2081 = vrcp.f32 %v2466_v21  ;;  %v282_v4 = vperm.slane %v2673_v62, 0  ;;  %s2468_s23 = smov 120   ;;  %s2469_s24 = smov 112  }
  0x3d   :  { %s2470_s9 = smov 96   ;;  %s2472_s27 = smov 16  }
  0x3e   :  { %s3050_s29 = sld [smem:[#allocation32_spill]] }
  0x40   :  { %v2633_v0 = vld [vmem:[%s3048_s3] sm:$0xff]  ;;  %v2640_v2 = vld [vmem:[%s3048_s3 + $0x8] sm:$0xff] }
  0x41   :  { %v224_v1 = vsel %vm223_vm0, %v2633_v0, 0.0  ;;  %v227_v3 = vsel %vm223_vm0, %v2640_v2, 0.0  ;;  %v2080_v5 = vpop.eup %2079  ;;  %v1974_v28 = vld [vmem:[%s3049_s0 + $0x8] sm:$0xff]  ;;  %v1973_v30 = vld [vmem:[%s3049_s0] sm:$0xff] }
  0x42   :  { %225 = vadd.xlane.f32.xlu0 %v224_v1  ;;  %v231_v6 = vmul.f32 32.0, %v2080_v5  ;;  %vm235_vm1 = vweird.f32 %v2080_v5  ;;  %v2082_v22 = vpop.eup %2081  ;;  %350 = vmatpush.bf16.msra.mxu0 %v1974_v28 }
  0x43   :  { %v250_v23 = vmul.f32 31.0, %v2082_v22  ;;  %vm254_vm2 = vweird.f32 %v2082_v22 }
  0x44   :  { %v232_v7 = vsub.f32 1.0, %v231_v6  ;;  %s1847_s12 = sshll.u32 %s3050_s29, 4  ;;  %s1848_s12 = int_to_ptr.hbm [resolvable:$true] %s1847_s12 }
  0x45   :  { %v251_v24 = vsub.f32 1.0, %v250_v23 }
  0x46   :  { %v233_v8 = vmul.f32 %v2080_v5, %v232_v7  ;;  %351 = vmatpush.bf16.msra.mxu0 %v1973_v30 }
  0x47   :  { %v252_v25 = vmul.f32 %v2082_v22, %v251_v24 }
  0x48   :  { %v234_v9 = vadd.f32 %v2080_v5, %v233_v8 }
  0x49   :  { %v253_v26 = vadd.f32 %v2082_v22, %v252_v25 }
  0x4a   :  { %228 = vadd.xlane.f32.xlu0 %v227_v3  ;;  %v2644_v10 = vsel %vm235_vm1, %v2080_v5, %v234_v9  ;;  %vm688_vm1 = vcmask 1043456  }
  0x4b   :  { %v2660_v27 = vsel %vm254_vm2, %v2082_v22, %v253_v26  ;;  %vm878_vm2 = vcmask 130048  }
  0xb5   :  { %v226_v11 = vpop.xlane.xlu0 %225 }
  0xb6   :  { %v237_v12 = vmul.f32 %v2644_v10, %v226_v11 }
  0xb8   :  { %v2648_v13 = vsub.f32 %v2633_v0, %v237_v12  ;;  %v2679_v12 = vld [vmem:[%s3035_s19] sm:$0x7] }
  0xb9   :  { %v317_v22 = vperm.slane %v2679_v12, 0 }
  0xba   :  { %v241_v14 = vmul.f32 %v2648_v13, %v2648_v13 }
  0xbc   :  { %v243_v15 = vsel %vm223_vm0, %v241_v14, 0.0 }
  0xbd   :  { %244 = vadd.xlane.f32.xlu1 %v243_v15  ;;  %v229_v16 = vpop.xlane.xlu0 %228  ;;  %v283_v15 = vmul.f32 %v282_v4, %v2648_v13 }
  0xbe   :  { %v238_v17 = vmul.f32 %v2644_v10, %v229_v16 }
  0xc0   :  { %v2655_v18 = vsub.f32 %v2640_v2, %v238_v17 }
  0xc2   :  { %v242_v19 = vmul.f32 %v2655_v18, %v2655_v18  ;;  %v284_v17 = vmul.f32 %v282_v4, %v2655_v18 }
  0xc4   :  { %v246_v20 = vsel %vm223_vm0, %v242_v19, 0.0 }
  0xc5   :  { %247 = vadd.xlane.f32.xlu1 %v246_v20 }
 0x130   :  { %v245_v29 = vpop.xlane.xlu1 %244 }
 0x131   :  { %v256_v31 = vmul.f32 %v2660_v27, %v245_v29  ;;  %v2072_v29 = vld [vmem:[#allocation8] ss:$0 sm:$0xff] }
 0x133   :  { %2083 = vrsqrt.f32 %v256_v31  ;;  %vm265_vm3 = vcmp.eq.f32.partialorder %v256_v31, inf  ;;  %v268_v44 = vand.u32 2147483648, %v256_v31  ;;  %vm267_vm4 = vcmp.eq.f32.partialorder %v256_v31, 0.0 }
 0x138   :  { %v248_v32 = vpop.xlane.xlu1 %247 }
 0x139   :  { %v2084_v33 = vpop.eup %2083  ;;  %v257_v34 = vmul.f32 %v2660_v27, %v248_v32 }
 0x13a   :  { %v259_v35 = vmul.f32 %v2084_v33, %v256_v31 }
 0x13b   :  { %2085 = vrsqrt.f32 %v257_v34  ;;  %vm277_vm5 = vcmp.eq.f32.partialorder %v257_v34, inf  ;;  %v280_v52 = vand.u32 2147483648, %v257_v34  ;;  %vm279_vm6 = vcmp.eq.f32.partialorder %v257_v34, 0.0 }
 0x13c   :  { %v260_v36 = vmul.f32 %v2084_v33, %v259_v35 }
 0x13e   :  { %v261_v37 = vmul.f32 0.5, %v260_v36 }
 0x140   :  { %v262_v38 = vsub.f32 1.5, %v261_v37 }
 0x141   :  { %v2086_v39 = vpop.eup %2085 }
 0x142   :  { %v263_v40 = vmul.f32 %v2084_v33, %v262_v38  ;;  %v271_v41 = vmul.f32 %v2086_v39, %v257_v34 }
 0x144   :  { %v264_v42 = vmul.f32 %v263_v40, %v256_v31  ;;  %v272_v43 = vmul.f32 %v2086_v39, %v271_v41 }
 0x146   :  { %v266_v45 = vsel %vm265_vm3, %v256_v31, %v264_v42  ;;  %v273_v46 = vmul.f32 0.5, %v272_v43  ;;  %vm881_vm3 = vcmask 195584  }
 0x147   :  { %v269_v47 = vsel %vm267_vm4, %v268_v44, %v266_v45 }
 0x148   :  { %v274_v48 = vsub.f32 1.5, %v273_v46  ;;  %v285_v49 = vadd.f32 1e-06, %v269_v47 }
 0x14a   :  { %v275_v50 = vmul.f32 %v2086_v39, %v274_v48  ;;  %2087 = vrcp.f32 %v285_v49  ;;  %v298_v63 = vand.u32 2147483648, %v285_v49  ;;  %vm292_vm8 = vweird.f32 %v285_v49 }
 0x14b   :  { %v296_v1 = vand.u32 2147483647, %v285_v49 }
 0x14c   :  { %v276_v51 = vmul.f32 %v275_v50, %v257_v34  ;;  %v299_v7 = vor.u32 1.1754944e-38, %v298_v63 }
 0x14d   :  { %vm297_vm10 = vcmp.eq.f32.partialorder %v296_v1, 8.507059e+37 }
 0x14e   :  { %v278_v53 = vsel %vm277_vm5, %v257_v34, %v276_v51 }
 0x14f   :  { %v281_v54 = vsel %vm279_vm6, %v280_v52, %v278_v53 }
 0x150   :  { %v2088_v55 = vpop.eup %2087  ;;  %v286_v56 = vadd.f32 1e-06, %v281_v54 }
 0x151   :  { %v288_v57 = vmul.f32 %v2088_v55, %v285_v49  ;;  %vm293_vm7 = vweird.f32 %v2088_v55 }
 0x152   :  { %2089 = vrcp.f32 %v286_v56  ;;  %vm294_vm9 = vmor %vm292_vm8, %vm293_vm7  ;;  %v313_v8 = vand.u32 2147483648, %v286_v56  ;;  %v311_v11 = vand.u32 2147483647, %v286_v56  ;;  %vm307_vm12 = vweird.f32 %v286_v56 }
 0x153   :  { %v289_v58 = vsub.f32 1.0, %v288_v57 }
 0x154   :  { %v314_v19 = vor.u32 1.1754944e-38, %v313_v8  ;;  %vm312_vm14 = vcmp.eq.f32.partialorder %v311_v11, 8.507059e+37 }
 0x155   :  { %v290_v59 = vmul.f32 %v2088_v55, %v289_v58 }
 0x157   :  { %v291_v60 = vadd.f32 %v2088_v55, %v290_v59 }
 0x158   :  { %v2090_v61 = vpop.eup %2089 }
 0x159   :  { %v303_v3 = vmul.f32 %v2090_v61, %v286_v56  ;;  %v295_v5 = vsel %vm294_vm9, %v2088_v55, %v291_v60  ;;  %vm308_vm11 = vweird.f32 %v2090_v61 }
 0x15a   :  { %v300_v14 = vsel %vm297_vm10, %v299_v7, %v295_v5  ;;  %vm309_vm13 = vmor %vm307_vm12, %vm308_vm11 }
 0x15b   :  { %v304_v6 = vsub.f32 1.0, %v303_v3  ;;  %v301_v20 = vmul.f32 %v300_v14, %v283_v15 }
 0x15d   :  { %v305_v9 = vmul.f32 %v2090_v61, %v304_v6  ;;  %v318_v25 = vadd.f32 %v317_v22, %v301_v20 }
 0x15f   :  { %v306_v16 = vadd.f32 %v2090_v61, %v305_v9 }
 0x161   :  { %v310_v21 = vsel %vm309_vm13, %v2090_v61, %v306_v16 }
 0x162   :  { %v315_v23 = vsel %vm312_vm14, %v314_v19, %v310_v21 }
 0x163   :  { %v316_v24 = vmul.f32 %v315_v23, %v284_v17 }
 0x165   :  { %v319_v26 = vadd.f32 %v317_v22, %v316_v24 }
 0x167   :  { %v320_v28 = vpack.c.bf16 %v319_v26, %v318_v25 }
 0x169   :  { %1873 = vmatmul.msk.bf16.vlgmr.msra.gmra.mxu0 %vm223_vm0, %v320_v28  ;;  %v387_v28 = vld [vmem:[#allocation5 + $0x8] sm:$0xff] }
 0x1e6   :  { %v353_v13 = vpop.f32.mrf.mxu0 }
 0x1e7   :  { %v354_v30 = vadd.f32 %v2072_v29, %v353_v13  ;;  %v386_v13 = vld [vmem:[#allocation5] sm:$0xff] }
 0x1e9   :  { %372 = vrot.lane.b32.xlu1 %v354_v30, %s2467_s22  ;;  %360 = vrot.lane.b32.xlu2 %v354_v30, %s2468_s23  ;;  %v378_v35 = vpack.c.bf16 %v354_v30, %v354_v30 }
 0x1eb   :  { %v395_v36 = vunpack.c.l.b16 %v378_v35 }
 0x1ed   :  { %v396_v37 = vpack.c.b16 %v395_v36, %v395_v36  ;;  %v388_v36 = vld [vmem:[#allocation5 + $0x10] sm:$0xff] }
 0x1ee   :  { %v355_v18 = vpop.f32.mrf.mxu0 }
 0x1ef   :  { %v356_v31 = vadd.f32 %v2072_v29, %v355_v18 }
 0x1f1   :  { %368 = vrot.lane.b32.xlu0 %v356_v31, %s2469_s24  ;;  %362 = vrot.lane.b32.xlu2 %v356_v31, %s2468_s23  ;;  %v379_v32 = vpack.c.bf16 %v356_v31, %v356_v31 }
 0x1f3   :  { %v420_v33 = vunpack.c.l.b16 %v379_v32 }
 0x1f5   :  { %v421_v34 = vpack.c.b16 %v420_v33, %v420_v33 }
 0x1f9   :  { %366 = vrot.lane.b32.xlu2 %v354_v30, %s2469_s24 }
 0x201   :  { %374 = vrot.lane.b32.xlu2 %v356_v31, %s2467_s22 }
 0x209   :  { %422 = vrot.lane.b32.xlu2 %v421_v34, %s2470_s9 }
 0x211   :  { %397 = vrot.lane.b32.xlu2 %v396_v37, %s2470_s9 }
 0x243   :  { %v361_v38 = vpop.permute.xlu2 %360 }
 0x244   :  { %v380_v39 = vpack.c.bf16 %v361_v38, %v361_v38 }
 0x246   :  { %v444_v40 = vunpack.c.l.b16 %v380_v39 }
 0x248   :  { %v445_v41 = vpack.c.b16 %v444_v40, %v444_v40 }
 0x24a   :  { %446 = vrot.lane.b32.xlu0 %v445_v41, %s2470_s9 }
 0x24b   :  { %v363_v42 = vpop.permute.xlu2 %362 }
 0x24c   :  { %v381_v43 = vpack.c.bf16 %v363_v42, %v363_v42  ;;  %v390_v42 = vld [vmem:[#allocation5 + $0x20] sm:$0xff] }
 0x24e   :  { %v468_v44 = vunpack.c.l.b16 %v381_v43 }
 0x250   :  { %v2694_v45 = vpack.c.b16 %v468_v44, %v468_v44 }
 0x252   :  { %470 = vrot.lane.b32.xlu1 %v2694_v45, %s2470_s9 }
 0x253   :  { %v367_v46 = vpop.permute.xlu2 %366 }
 0x254   :  { %v382_v47 = vpack.c.bf16 %v367_v46, %v367_v46 }
 0x256   :  { %v492_v48 = vunpack.c.l.b16 %v382_v47 }
 0x258   :  { %v2698_v49 = vpack.c.b16 %v492_v48, %v492_v48  ;;  %v389_v48 = vld [vmem:[#allocation5 + $0x18] sm:$0xff] }
 0x25a   :  { %494 = vrot.lane.b32.xlu1 %v2698_v49, %s2470_s9 }
 0x25b   :  { %v373_v50 = vpop.permute.xlu1 %372  ;;  %v375_v51 = vpop.permute.xlu2 %374 }
 0x25c   :  { %v384_v52 = vpack.c.bf16 %v373_v50, %v373_v50  ;;  %v385_v60 = vpack.c.bf16 %v375_v51, %v375_v51  ;;  %v392_v50 = vld [vmem:[#allocation5 + $0x30] sm:$0xff] }
 0x25e   :  { %v540_v53 = vunpack.c.l.b16 %v384_v52  ;;  %v564_v1 = vunpack.c.l.b16 %v385_v60 }
 0x260   :  { %v2702_v54 = vpack.c.b16 %v540_v53, %v540_v53  ;;  %v2715_v4 = vpack.c.b16 %v564_v1, %v564_v1 }
 0x262   :  { %726 = vrot.lane.b32.xlu1 %v445_v41, %s2456_s26  ;;  %542 = vrot.lane.b32.xlu2 %v2702_v54, %s2470_s9 }
 0x263   :  { %v369_v55 = vpop.permute.xlu0 %368  ;;  %v423_v56 = vpop.permute.xlu2 %422 }
 0x264   :  { %v383_v57 = vpack.c.bf16 %v369_v55, %v369_v55  ;;  %v428_v58 = vsel %vm399_vm15, %v423_v56, 0 }
 0x265   :  { %437 = vmatpush.bf16.xpose.msra.mxu2 %v428_v58 }
 0x266   :  { %v516_v59 = vunpack.c.l.b16 %v383_v57 }
 0x268   :  { %v2708_v61 = vpack.c.b16 %v516_v59, %v516_v59 }
 0x26a   :  { %518 = vrot.lane.b32.xlu0 %v2708_v61, %s2470_s9  ;;  %705 = vrot.lane.b32.xlu2 %v421_v34, %s2456_s26 }
 0x26b   :  { %v398_v63 = vpop.permute.xlu2 %397 }
 0x26c   :  { %1875 = vmatmul.msk.bf16.vlgmr.msra.gmra.mxu2 %vm399_vm15, %v379_v32  ;;  %v404_v3 = vsel %vm399_vm15, %v398_v63, 0 }
 0x26d   :  { %413 = vmatpush.bf16.xpose.msra.mxu1 %v404_v3 }
 0x272   :  { %566 = vrot.lane.b32.xlu0 %v2715_v4, %s2470_s9 }
 0x274   :  { %1874 = vmatmul.msk.bf16.vlgmr.msra.gmra.mxu1 %vm399_vm15, %v378_v35 }
 0x27a   :  { %683 = vrot.lane.b32.xlu0 %v396_v37, %s2456_s26 }
 0x2bc   :  { %v447_v5 = vpop.permute.xlu0 %446  ;;  %v543_v6 = vpop.permute.xlu2 %542 }
 0x2bd   :  { %v452_v7 = vsel %vm399_vm15, %v447_v5, 0  ;;  %v548_v8 = vsel %vm399_vm15, %v543_v6, 0 }
 0x2be   :  { %461 = vmatpush.bf16.xpose.msra.mxu3 %v452_v7 }
 0x2c4   :  { %v471_v9 = vpop.permute.xlu1 %470  ;;  %v706_v19 = vpop.permute.xlu2 %705 }
 0x2c5   :  { %1876 = vmatmul.msk.bf16.vlgmr.msra.gmra.mxu3 %vm399_vm15, %v380_v39  ;;  %v476_v11 = vsel %vm399_vm15, %v471_v9, 0  ;;  %v711_v22 = vsel %vm688_vm1, %v706_v19, 0 }
 0x2c6   :  { %557 = vmatpush.bf16.xpose.msrb.mxu3 %v548_v8  ;;  %485 = vmatpush.bf16.xpose.msrb.mxu0 %v476_v11 }
 0x2cc   :  { %v495_v14 = vpop.permute.xlu1 %494 }
 0x2cd   :  { %1877 = vmatmul.msk.bf16.vlgmr.msrb.gmra.mxu0 %vm399_vm15, %v381_v43  ;;  %v500_v15 = vsel %vm399_vm15, %v495_v14, 0 }
 0x2ce   :  { %509 = vmatpush.bf16.xpose.msrb.mxu1 %v500_v15 }
 0x2d4   :  { %v727_v16 = vpop.permute.xlu1 %726 }
 0x2d5   :  { %v732_v17 = vsel %vm688_vm1, %v727_v16, 0  ;;  %1878 = vmatmul.msk.bf16.vlgmr.msrb.gmra.mxu1 %vm399_vm15, %v382_v47  ;;  %1880 = vmatmul.msk.bf16.vlgmr.msrb.gmra.mxu3 %vm399_vm15, %v384_v52 }
 0x2d6   :  { %741 = vmatpush.bf16.msra.mxu3 %v732_v17  ;;  %v391_v17 = vld [vmem:[#allocation5 + $0x28] sm:$0xff] }
 0x2dc   :  { %v519_v20 = vpop.permute.xlu0 %518 }
 0x2dd   :  { %v524_v21 = vsel %vm399_vm15, %v519_v20, 0 }
 0x2de   :  { %533 = vmatpush.bf16.xpose.msrb.mxu2 %v524_v21  ;;  %v393_v21 = vld [vmem:[#allocation5 + $0x38] sm:$0xff] }
 0x2e4   :  { %v567_v23 = vpop.permute.xlu0 %566 }
 0x2e5   :  { %v572_v24 = vsel %vm399_vm15, %v567_v23, 0  ;;  %1879 = vmatmul.msk.bf16.vlgmr.msrb.gmra.mxu2 %vm399_vm15, %v383_v57 }
 0x2e6   :  { %720 = vmatpush.bf16.msra.mxu2 %v711_v22  ;;  %581 = vmatpush.bf16.xpose.msra.mxu0 %v572_v24 }
 0x2ec   :  { %v684_v25 = vpop.permute.xlu0 %683 }
 0x2ed   :  { %v690_v26 = vsel %vm688_vm1, %v684_v25, 0  ;;  %1881 = vmatmul.msk.bf16.vlgmr.msra.gmra.mxu0 %vm399_vm15, %v385_v60 }
 0x2ee   :  { %699 = vmatpush.bf16.msra.mxu1 %v690_v26 }
 0x2ef   :  { %v439_v29 = vpop.f32.mrf.mxu2 }
 0x2f0   :  { %v440_v30 = vadd.f32 %v439_v29, %v387_v28 }
 0x2f1   :  { %v415_v18 = vpop.f32.mrf.mxu1 }
 0x2f2   :  { %v416_v31 = vadd.f32 %v415_v18, %v386_v13  ;;  %v590_v32 = vsel %vm399_vm15, %v440_v30, -inf }
 0x2f3   :  { %591 = vmax.xlane.f32.xlu2 %v590_v32 }
 0x2f4   :  { %v587_v33 = vsel %vm399_vm15, %v416_v31, -inf }
 0x2f5   :  { %588 = vmax.xlane.f32.xlu0 %v587_v33 }
 0x2f7   :  { %v441_v34 = vpop.f32.mrf.mxu2 }
 0x2f9   :  { %v417_v35 = vpop.f32.mrf.mxu1 }
 0x348   :  { %v463_v37 = vpop.f32.mrf.mxu3 }
 0x349   :  { %v464_v38 = vadd.f32 %v463_v37, %v388_v36 }
 0x34a   :  { %v487_v39 = vpop.f32.mrf.mxu0 }
 0x34b   :  { %v593_v40 = vsel %vm399_vm15, %v464_v38, -inf  ;;  %v488_v52 = vadd.f32 %v487_v39, %v389_v48 }
 0x34c   :  { %594 = vmax.xlane.f32.xlu1 %v593_v40 }
 0x34d   :  { %v596_v57 = vsel %vm399_vm15, %v488_v52, -inf }
 0x350   :  { %v465_v41 = vpop.f32.mrf.mxu3 }
 0x352   :  { %v489_v43 = vpop.f32.mrf.mxu0  ;;  %v511_v44 = vpop.f32.mrf.mxu1 }
 0x353   :  { %v512_v46 = vadd.f32 %v511_v44, %v390_v42 }
 0x355   :  { %v599_v47 = vsel %vm399_vm15, %v512_v46, -inf }
 0x356   :  { %600 = vmax.xlane.f32.xlu2 %v599_v47 }
 0x358   :  { %v559_v51 = vpop.f32.mrf.mxu3 }
 0x359   :  { %v560_v53 = vadd.f32 %v559_v51, %v392_v50 }
 0x35a   :  { %v513_v55 = vpop.f32.mrf.mxu1 }
 0x35b   :  { %v605_v56 = vsel %vm399_vm15, %v560_v53, -inf }
 0x35c   :  { %606 = vmax.xlane.f32.xlu0 %v605_v56 }
 0x35e   :  { %597 = vmax.xlane.f32.xlu2 %v596_v57 }
 0x360   :  { %v561_v58 = vpop.f32.mrf.mxu3 }
 0x366   :  { %v592_v59 = vpop.xlane.xlu2 %591 }
 0x367   :  { %v612_v60 = vsub.f32 %v440_v30, %v592_v59 }
 0x368   :  { %v535_v63 = vpop.f32.mrf.mxu2  ;;  %v589_v1 = vpop.xlane.xlu0 %588 }
 0x369   :  { %v621_v3 = vmul.f32 1.442695, %v612_v60  ;;  %v611_v5 = vsub.f32 %v416_v31, %v589_v1  ;;  %v536_v19 = vadd.f32 %v535_v63, %v391_v17 }
 0x36a   :  { %v583_v6 = vpop.f32.mrf.mxu0 }
 0x36b   :  { %2091 = vpow2.f32 %v621_v3  ;;  %v619_v7 = vmul.f32 1.442695, %v611_v5  ;;  %v602_v20 = vsel %vm399_vm15, %v536_v19, -inf  ;;  %v584_v22 = vadd.f32 %v583_v6, %v393_v21 }
 0x36d   :  { %2093 = vpow2.f32 %v619_v7  ;;  %v608_v23 = vsel %vm399_vm15, %v584_v22, -inf }
 0x370   :  { %v537_v8 = vpop.f32.mrf.mxu2 }
 0x371   :  { %v2092_v9 = vpop.eup %2091 }
 0x372   :  { %v585_v11 = vpop.f32.mrf.mxu0  ;;  %v638_v14 = vsel %vm399_vm15, %v2092_v9, 0.0 }
 0x373   :  { %v2094_v15 = vpop.eup %2093  ;;  %639 = vadd.xlane.f32.xlu0 %v638_v14 }
 0x374   :  { %v635_v16 = vsel %vm399_vm15, %v2094_v15, 0.0 }
 0x375   :  { %636 = vadd.xlane.f32.xlu1 %v635_v16 }
 0x376   :  { %747 = vrot.lane.b32.xlu2 %v2694_v45, %s2456_s26 }
 0x37d   :  { %603 = vmax.xlane.f32.xlu1 %v602_v20 }
 0x385   :  { %609 = vmax.xlane.f32.xlu1 %v608_v23 }
 0x39e   :  { %789 = vrot.lane.b32.xlu1 %v2708_v61, %s2456_s26 }
 0x3bf   :  { %v595_v24 = vpop.xlane.xlu1 %594 }
 0x3c0   :  { %v613_v28 = vsub.f32 %v464_v38, %v595_v24 }
 0x3c2   :  { %v623_v13 = vmul.f32 1.442695, %v613_v28 }
 0x3c9   :  { %v601_v25 = vpop.xlane.xlu2 %600 }
 0x3ca   :  { %v615_v26 = vsub.f32 %v512_v46, %v601_v25 }
 0x3cc   :  { %v627_v29 = vmul.f32 1.442695, %v615_v26 }
 0x3ce   :  { %2095 = vpow2.f32 %v627_v29 }
 0x3cf   :  { %v607_v45 = vpop.xlane.xlu0 %606  ;;  %2097 = vpow2.f32 %v623_v13 }
 0x3d0   :  { %v617_v30 = vsub.f32 %v560_v53, %v607_v45 }
 0x3d1   :  { %v598_v18 = vpop.xlane.xlu2 %597 }
 0x3d2   :  { %v631_v31 = vmul.f32 1.442695, %v617_v30  ;;  %v614_v32 = vsub.f32 %v488_v52, %v598_v18 }
 0x3d4   :  { %v2750_v33 = vpop.eup %2095  ;;  %2099 = vpow2.f32 %v631_v31  ;;  %v625_v34 = vmul.f32 1.442695, %v614_v32 }
 0x3d5   :  { %v647_v61 = vsel %vm399_vm15, %v2750_v33, 0.0  ;;  %v2098_v35 = vpop.eup %2097 }
 0x3d6   :  { %2101 = vpow2.f32 %v625_v34  ;;  %648 = vadd.xlane.f32.xlu2 %v647_v61  ;;  %v641_v41 = vsel %vm399_vm15, %v2098_v35, 0.0 }
 0x3d9   :  { %v748_v36 = vpop.permute.xlu2 %747 }
 0x3da   :  { %v2100_v37 = vpop.eup %2099  ;;  %v753_v38 = vsel %vm688_vm1, %v748_v36, 0 }
 0x3db   :  { %762 = vmatpush.bf16.msrb.mxu0 %v753_v38  ;;  %v653_v39 = vsel %vm399_vm15, %v2100_v37, 0.0 }
 0x3dc   :  { %v2102_v40 = vpop.eup %2101  ;;  %654 = vadd.xlane.f32.xlu1 %v653_v39 }
 0x3dd   :  { %v644_v42 = vsel %vm399_vm15, %v2102_v40, 0.0 }
 0x3de   :  { %642 = vadd.xlane.f32.xlu2 %v641_v41  ;;  %645 = vadd.xlane.f32.xlu0 %v644_v42 }
 0x3e6   :  { %v640_v43 = vpop.xlane.xlu0 %639 }
 0x3e7   :  { %2103 = vrcp.f32 %v640_v43 }
 0x3e8   :  { %v637_v44 = vpop.xlane.xlu1 %636 }
 0x3e9   :  { %2105 = vrcp.f32 %v637_v44 }
 0x3ed   :  { %v2104_v46 = vpop.eup %2103 }
 0x3ee   :  { %v668_v47 = vmul.f32 %v2104_v46, %v2092_v9 }
 0x3ef   :  { %v2106_v48 = vpop.eup %2105 }
 0x3f0   :  { %v676_v50 = vpack.c.bf16 %v668_v47, %v668_v47  ;;  %v667_v51 = vmul.f32 %v2106_v48, %v2094_v15  ;;  %v604_v52 = vpop.xlane.xlu1 %603 }
 0x3f1   :  { %v616_v53 = vsub.f32 %v536_v19, %v604_v52 }
 0x3f2   :  { %v675_v55 = vpack.c.bf16 %v667_v51, %v667_v51  ;;  %1883 = vmatmul.msk.bf16.vlgmr.msra.gmra.mxu2 %vm399_vm15, %v676_v50 }
 0x3f3   :  { %v629_v56 = vmul.f32 1.442695, %v616_v53 }
 0x3f4   :  { %1882 = vmatmul.msk.bf16.vlgmr.msra.gmra.mxu1 %vm399_vm15, %v675_v55 }
 0x3f5   :  { %2107 = vpow2.f32 %v629_v56  ;;  %831 = vrot.lane.b32.xlu1 %v2715_v4, %s2456_s26 }
 0x3f6   :  { %810 = vrot.lane.b32.xlu2 %v2702_v54, %s2456_s26 }
 0x3f8   :  { %v610_v57 = vpop.xlane.xlu1 %609 }
 0x3f9   :  { %v618_v58 = vsub.f32 %v584_v22, %v610_v57  ;;  %v1976_v57 = vld [vmem:[%s3022_s6 + $0x8] sm:$0xff] }
 0x3fb   :  { %v2108_v59 = vpop.eup %2107  ;;  %v633_v60 = vmul.f32 1.442695, %v618_v58  ;;  %v1975_v58 = vld [vmem:[%s3022_s6] sm:$0xff] }
 0x3fc   :  { %v650_v63 = vsel %vm399_vm15, %v2108_v59, 0.0 }
 0x3fd   :  { %2109 = vpow2.f32 %v633_v60  ;;  %651 = vadd.xlane.f32.xlu0 %v650_v63 }
 0x403   :  { %v2110_v1 = vpop.eup %2109 }
 0x404   :  { %v656_v3 = vsel %vm399_vm15, %v2110_v1, 0.0 }
 0x405   :  { %657 = vadd.xlane.f32.xlu0 %v656_v3 }
 0x410   :  { %v790_v5 = vpop.permute.xlu1 %789 }
 0x411   :  { %v795_v6 = vsel %vm688_vm1, %v790_v5, 0 }
 0x412   :  { %804 = vmatpush.bf16.msrb.mxu2 %v795_v6 }
 0x419   :  { %768 = vrot.lane.b32.xlu0 %v2698_v49, %s2456_s26  ;;  %s2471_s26 = smov 24  }
 0x449   :  { %v649_v54 = vpop.xlane.xlu2 %648 }
 0x44f   :  { %v655_v19 = vpop.xlane.xlu1 %654 }
 0x451   :  { %v646_v4 = vpop.xlane.xlu0 %645  ;;  %v643_v7 = vpop.xlane.xlu2 %642 }
 0x452   :  { %2111 = vrcp.f32 %v646_v4 }
 0x453   :  { %2113 = vrcp.f32 %v643_v7 }
 0x454   :  { %2115 = vrcp.f32 %v655_v19 }
 0x458   :  { %v2112_v8 = vpop.eup %2111 }
 0x459   :  { %v2114_v9 = vpop.eup %2113  ;;  %v670_v11 = vmul.f32 %v2112_v8, %v2102_v40  ;;  %v811_v14 = vpop.permute.xlu2 %810 }
 0x45a   :  { %v669_v15 = vmul.f32 %v2114_v9, %v2098_v35  ;;  %v816_v16 = vsel %vm688_vm1, %v811_v14, 0  ;;  %v2116_v49 = vpop.eup %2115 }
 0x45b   :  { %v678_v17 = vpack.c.bf16 %v670_v11, %v670_v11  ;;  %825 = vmatpush.bf16.msrb.mxu3 %v816_v16  ;;  %v673_v22 = vmul.f32 %v2116_v49, %v2100_v37 }
 0x45c   :  { %v677_v20 = vpack.c.bf16 %v669_v15, %v669_v15 }
 0x45d   :  { %1885 = vmatmul.msk.bf16.vlgmr.msrb.gmra.mxu0 %vm399_vm15, %v678_v17  ;;  %v681_v24 = vpack.c.bf16 %v673_v22, %v673_v22  ;;  %v2073_v17 = vld [vmem:[#allocation10] ss:$0 sm:$0xff] }
 0x45e   :  { %1884 = vmatmul.msk.bf16.vlgmr.msra.gmra.mxu3 %vm399_vm15, %v677_v20 }
 0x467   :  { %v832_v21 = vpop.permute.xlu1 %831 }
 0x468   :  { %v837_v23 = vsel %vm688_vm1, %v832_v21, 0 }
 0x469   :  { %846 = vmatpush.bf16.msra.mxu0 %v837_v23 }
 0x46e   :  { %1888 = vmatmul.msk.bf16.vlgmr.msrb.gmra.mxu3 %vm399_vm15, %v681_v24 }
 0x470   :  { %v652_v25 = vpop.xlane.xlu0 %651 }
 0x471   :  { %2117 = vrcp.f32 %v652_v25  ;;  %v701_v26 = vpop.f32.mrf.mxu1 }
 0x475   :  { %v722_v28 = vpop.f32.mrf.mxu2 }
 0x477   :  { %v2118_v29 = vpop.eup %2117 }
 0x478   :  { %v672_v13 = vmul.f32 %v2118_v29, %v2108_v59  ;;  %v658_v45 = vpop.xlane.xlu0 %657 }
 0x479   :  { %2119 = vrcp.f32 %v658_v45  ;;  %v703_v30 = vpop.f32.mrf.mxu1 }
 0x47a   :  { %v680_v18 = vpack.c.bf16 %v672_v13, %v672_v13  ;;  %2121 = vrcp.f32 %v649_v54 }
 0x47c   :  { %1887 = vmatmul.msk.bf16.vlgmr.msrb.gmra.mxu2 %vm399_vm15, %v680_v18 }
 0x47d   :  { %v724_v31 = vpop.f32.mrf.mxu2 }
 0x47f   :  { %v2120_v32 = vpop.eup %2119 }
 0x480   :  { %v674_v34 = vmul.f32 %v2120_v32, %v2110_v1  ;;  %v2122_v35 = vpop.eup %2121  ;;  %v1980_v32 = vld [vmem:[#allocation14 + $0x8] sm:$0xff] }
 0x481   :  { %v671_v36 = vmul.f32 %v2122_v35, %v2750_v33  ;;  %1078 = vmatpush.bf16.msra.mxu3 %v1980_v32  ;;  %v1972_v35 = vld [vmem:[#allocation2] sm:$0xff] }
 0x482   :  { %v682_v61 = vpack.c.bf16 %v674_v34, %v674_v34  ;;  %v1979_v34 = vld [vmem:[#allocation14] sm:$0xff] }
 0x483   :  { %v679_v39 = vpack.c.bf16 %v671_v36, %v671_v36 }
 0x484   :  { %1889 = vmatmul.msk.bf16.vlgmr.msra.gmra.mxu0 %vm399_vm15, %v682_v61 }
 0x485   :  { %1079 = vmatpush.bf16.msra.mxu3 %v1979_v34  ;;  %v2074_v34 = vld [vmem:[%s3027_s11] ss:$0 sm:$0xff] }
 0x488   :  { %1920 = vmatmul.msk.bf16.vlgmr.msra.gmra.mxu3 %vm223_vm0, %v1972_v35 }
 0x48b   :  { %v769_v37 = vpop.permute.xlu0 %768 }
 0x48c   :  { %v774_v38 = vsel %vm688_vm1, %v769_v37, 0  ;;  %v1978_v37 = vld [vmem:[#allocation11 + $0x8] sm:$0xff] }
 0x48d   :  { %783 = vmatpush.bf16.msrb.mxu1 %v774_v38  ;;  %1036 = vmatpush.bf16.msra.mxu2 %v1978_v37  ;;  %v1977_v38 = vld [vmem:[#allocation11] sm:$0xff] }
 0x490   :  { %1886 = vmatmul.msk.bf16.vlgmr.msrb.gmra.mxu1 %vm399_vm15, %v679_v39 }
 0x491   :  { %914 = vmatpush.bf16.msra.mxu1 %v1976_v57  ;;  %1037 = vmatpush.bf16.msra.mxu2 %v1977_v38 }
 0x495   :  { %915 = vmatpush.bf16.msra.mxu1 %v1975_v58 }
 0x4da   :  { %v764_v40 = vpop.f32.mrf.mxu0 }
 0x4e1   :  { %v743_v41 = vpop.f32.mrf.mxu3 }
 0x4e2   :  { %v2012_v42 = vpack.i.bf16 %v764_v40, %v743_v41  ;;  %v766_v43 = vpop.f32.mrf.mxu0 }
 0x4e4   :  { %2013 = vrot.lane.b32.xlu0 %v2012_v42, %s2453_s4 }
 0x4e9   :  { %v745_v44 = vpop.f32.mrf.mxu3 }
 0x4f1   :  { %v827_v46 = vpop.f32.mrf.mxu3 }
 0x4f9   :  { %v829_v47 = vpop.f32.mrf.mxu3 }
 0x4ff   :  { %v806_v48 = vpop.f32.mrf.mxu2 }
 0x501   :  { %v848_v50 = vpop.f32.mrf.mxu0 }
 0x502   :  { %v2022_v51 = vpack.i.bf16 %v848_v50, %v827_v46 }
 0x504   :  { %2023 = vrot.lane.b32.xlu1 %v2022_v51, %s2471_s26 }
 0x507   :  { %v808_v33 = vpop.f32.mrf.mxu2 }
 0x509   :  { %v850_v52 = vpop.f32.mrf.mxu0 }
 0x50d   :  { %v785_v53 = vpop.f32.mrf.mxu1 }
 0x50e   :  { %v2017_v55 = vpack.i.bf16 %v806_v48, %v785_v53 }
 0x510   :  { %2018 = vrot.lane.b32.xlu2 %v2017_v55, %s2472_s27 }
 0x515   :  { %v787_v56 = vpop.f32.mrf.mxu1 }
 0x556   :  { %v2014_v59 = vpop.permute.xlu0 %2013 }
 0x557   :  { %v2016_v63 = vunpack.i.h.bf16 %v2014_v59  ;;  %v2015_v1 = vunpack.i.l.bf16 %v2014_v59 }
 0x559   :  { %v877_v54 = vsel %vm399_vm15, %v722_v28, %v2016_v63  ;;  %v876_v4 = vsel %vm399_vm15, %v701_v26, %v2015_v1 }
 0x56a   :  { %v2019_v60 = vpop.permute.xlu2 %2018 }
 0x56b   :  { %v2021_v3 = vunpack.i.h.bf16 %v2019_v60  ;;  %v2020_v5 = vunpack.i.l.bf16 %v2019_v60 }
 0x56d   :  { %v880_v9 = vsel %vm878_vm2, %v877_v54, %v2021_v3  ;;  %v879_v11 = vsel %vm878_vm2, %v876_v4, %v2020_v5 }
 0x576   :  { %v2024_v6 = vpop.permute.xlu1 %2023 }
 0x577   :  { %v2026_v7 = vunpack.i.h.bf16 %v2024_v6  ;;  %v2025_v8 = vunpack.i.l.bf16 %v2024_v6 }
 0x579   :  { %v882_v14 = vsel %vm881_vm3, %v879_v11, %v2025_v8  ;;  %v883_v15 = vsel %vm881_vm3, %v880_v9, %v2026_v7  ;;  %v968_v8 = vperm.slane %v2673_v62, 1 }
 0x57a   :  { %v884_v16 = vpack.c.bf16 %v883_v15, %v882_v14 }
 0x57c   :  { %1898 = vmatmul.msk.bf16.vlgmr.msra.gmra.mxu1 %vm223_vm0, %v884_v16  ;;  %v1003_v16 = vperm.slane %v2679_v12, 1 }
 0x5f9   :  { %v917_v19 = vpop.f32.mrf.mxu1 }
 0x5fa   :  { %v918_v20 = vadd.f32 %v2073_v17, %v917_v19 }
 0x5fc   :  { %v2796_v49 = vadd.f32 %v918_v20, %v2633_v0 }
 0x5fe   :  { %v924_v21 = vsel %vm223_vm0, %v2796_v49, 0.0 }
 0x5ff   :  { %925 = vadd.xlane.f32.xlu0 %v924_v21 }
 0x601   :  { %v919_v22 = vpop.f32.mrf.mxu1 }
 0x602   :  { %v920_v23 = vadd.f32 %v2073_v17, %v919_v22 }
 0x604   :  { %v2801_v24 = vadd.f32 %v920_v23, %v2640_v2 }
 0x606   :  { %v927_v25 = vsel %vm223_vm0, %v2801_v24, 0.0 }
 0x607   :  { %928 = vadd.xlane.f32.xlu2 %v927_v25 }
 0x672   :  { %v926_v26 = vpop.xlane.xlu0 %925 }
 0x673   :  { %v930_v28 = vmul.f32 %v926_v26, %v2644_v10 }
 0x675   :  { %v2807_v29 = vsub.f32 %v2796_v49, %v930_v28 }
 0x677   :  { %v934_v0 = vmul.f32 %v2807_v29, %v2807_v29  ;;  %v969_v19 = vmul.f32 %v968_v8, %v2807_v29 }
 0x679   :  { %v936_v13 = vsel %vm223_vm0, %v934_v0, 0.0 }
 0x67a   :  { %v929_v45 = vpop.xlane.xlu2 %928  ;;  %937 = vadd.xlane.f32.xlu1 %v936_v13 }
 0x67b   :  { %v931_v2 = vmul.f32 %v929_v45, %v2644_v10 }
 0x67d   :  { %v2814_v30 = vsub.f32 %v2801_v24, %v931_v2 }
 0x67f   :  { %v935_v18 = vmul.f32 %v2814_v30, %v2814_v30  ;;  %v970_v12 = vmul.f32 %v968_v8, %v2814_v30 }
 0x681   :  { %v939_v31 = vsel %vm223_vm0, %v935_v18, 0.0 }
 0x682   :  { %940 = vadd.xlane.f32.xlu0 %v939_v31 }
 0x6ed   :  { %v938_v61 = vpop.xlane.xlu1 %937 }
 0x6ee   :  { %v942_v36 = vmul.f32 %v938_v61, %v2660_v27  ;;  %v1081_v61 = vpop.f32.mrf.mxu3 }
 0x6ef   :  { %v1082_v35 = vadd.f32 %v2074_v34, %v1081_v61 }
 0x6f0   :  { %2123 = vrsqrt.f32 %v942_v36  ;;  %vm951_vm4 = vcmp.eq.f32.partialorder %v942_v36, inf  ;;  %v954_v52 = vand.u32 2147483648, %v942_v36  ;;  %vm953_vm5 = vcmp.eq.f32.partialorder %v942_v36, 0.0 }
 0x6f5   :  { %v941_v39 = vpop.xlane.xlu0 %940 }
 0x6f6   :  { %v2124_v40 = vpop.eup %2123  ;;  %v943_v41 = vmul.f32 %v941_v39, %v2660_v27  ;;  %v1083_v30 = vpop.f32.mrf.mxu3 }
 0x6f7   :  { %v945_v42 = vmul.f32 %v2124_v40, %v942_v36  ;;  %v1084_v38 = vadd.f32 %v2074_v34, %v1083_v30 }
 0x6f8   :  { %2125 = vrsqrt.f32 %v943_v41  ;;  %vm963_vm6 = vcmp.eq.f32.partialorder %v943_v41, inf  ;;  %v966_v63 = vand.u32 2147483648, %v943_v41  ;;  %vm965_vm7 = vcmp.eq.f32.partialorder %v943_v41, 0.0 }
 0x6f9   :  { %v946_v43 = vmul.f32 %v2124_v40, %v945_v42  ;;  %v2037_v39 = vpack.i.bf16 %v1084_v38, %v1082_v35  ;;  %v2075_v42 = vld [vmem:[#allocation13] ss:$0 sm:$0xff] }
 0x6fb   :  { %v947_v44 = vmul.f32 0.5, %v946_v43  ;;  %2038 = vrot.lane.b32.xlu0 %v2037_v39, %s2467_s22  ;;  %2028 = vrot.lane.b32.xlu2 %v2037_v39, %s2468_s23 }
 0x6fd   :  { %v948_v46 = vsub.f32 1.5, %v947_v44 }
 0x6fe   :  { %v2126_v47 = vpop.eup %2125 }
 0x6ff   :  { %v949_v48 = vmul.f32 %v2124_v40, %v948_v46  ;;  %v957_v50 = vmul.f32 %v2126_v47, %v943_v41  ;;  %v2834_v40 = vpack.c.bf16 %v1084_v38, %v1084_v38 }
 0x701   :  { %v950_v51 = vmul.f32 %v949_v48, %v942_v36  ;;  %v958_v33 = vmul.f32 %v2126_v47, %v957_v50 }
 0x703   :  { %v952_v53 = vsel %vm951_vm4, %v942_v36, %v950_v51  ;;  %v959_v55 = vmul.f32 0.5, %v958_v33  ;;  %v2830_v36 = vpack.c.bf16 %v1082_v35, %v1082_v35  ;;  %2048 = vrot.lane.b32.xlu0 %v2037_v39, %s2469_s24 }
 0x704   :  { %v955_v56 = vsel %vm953_vm5, %v954_v52, %v952_v53 }
 0x705   :  { %v971_v57 = vadd.f32 1e-06, %v955_v56  ;;  %v960_v58 = vsub.f32 1.5, %v959_v55  ;;  %v1154_v37 = vsel %vm399_vm15, %v2830_v36, 0 }
 0x706   :  { %1163 = vmatpush.bf16.xpose.msrb.mxu0 %v1154_v37 }
 0x707   :  { %2127 = vrcp.f32 %v971_v57  ;;  %v961_v59 = vmul.f32 %v2126_v47, %v960_v58  ;;  %v984_v7 = vand.u32 2147483648, %v971_v57  ;;  %v982_v11 = vand.u32 2147483647, %v971_v57 }
 0x708   :  { %vm978_vm9 = vweird.f32 %v971_v57 }
 0x709   :  { %v962_v60 = vmul.f32 %v961_v59, %v943_v41  ;;  %v985_v17 = vor.u32 1.1754944e-38, %v984_v7  ;;  %vm983_vm11 = vcmp.eq.f32.partialorder %v982_v11, 8.507059e+37 }
 0x70b   :  { %v964_v1 = vsel %vm963_vm6, %v943_v41, %v962_v60  ;;  %v1173_v41 = vsel %vm399_vm15, %v2834_v40, 0 }
 0x70c   :  { %v967_v3 = vsel %vm965_vm7, %v966_v63, %v964_v1  ;;  %1182 = vmatpush.bf16.xpose.msrb.mxu1 %v1173_v41 }
 0x70d   :  { %v2128_v5 = vpop.eup %2127  ;;  %v972_v6 = vadd.f32 1e-06, %v967_v3 }
 0x70e   :  { %v974_v54 = vmul.f32 %v2128_v5, %v971_v57  ;;  %vm979_vm8 = vweird.f32 %v2128_v5 }
 0x70f   :  { %2129 = vrcp.f32 %v972_v6  ;;  %vm980_vm10 = vmor %vm978_vm9, %vm979_vm8  ;;  %v999_v26 = vand.u32 2147483648, %v972_v6  ;;  %v997_v28 = vand.u32 2147483647, %v972_v6  ;;  %vm993_vm13 = vweird.f32 %v972_v6 }
 0x710   :  { %v975_v4 = vsub.f32 1.0, %v974_v54 }
 0x711   :  { %v1000_v45 = vor.u32 1.1754944e-38, %v999_v26  ;;  %vm998_vm4 = vcmp.eq.f32.partialorder %v997_v28, 8.507059e+37 }
 0x712   :  { %v976_v9 = vmul.f32 %v2128_v5, %v975_v4 }
 0x714   :  { %v977_v14 = vadd.f32 %v2128_v5, %v976_v9 }
 0x715   :  { %v2130_v15 = vpop.eup %2129 }
 0x716   :  { %v981_v20 = vsel %vm980_vm10, %v2128_v5, %v977_v14  ;;  %v989_v21 = vmul.f32 %v2130_v15, %v972_v6  ;;  %vm994_vm12 = vweird.f32 %v2130_v15 }
 0x717   :  { %v986_v22 = vsel %vm983_vm11, %v985_v17, %v981_v20  ;;  %vm995_vm14 = vmor %vm993_vm13, %vm994_vm12  ;;  %vm1819_vm13 = vcmask 523264  }
 0x718   :  { %v987_v23 = vmul.f32 %v986_v22, %v969_v19  ;;  %v990_v25 = vsub.f32 1.0, %v989_v21  ;;  %v1142_v19 = vld [vmem:[#allocation7] sm:$0xff] }
 0x71a   :  { %v991_v62 = vmul.f32 %v2130_v15, %v990_v25  ;;  %v1004_v0 = vadd.f32 %v1003_v16, %v987_v23 }
 0x71c   :  { %v992_v13 = vadd.f32 %v2130_v15, %v991_v62 }
 0x71e   :  { %v996_v2 = vsel %vm995_vm14, %v2130_v15, %v992_v13 }
 0x71f   :  { %v1001_v29 = vsel %vm998_vm4, %v1000_v45, %v996_v2 }
 0x720   :  { %v1002_v18 = vmul.f32 %v1001_v29, %v970_v12 }
 0x722   :  { %v1005_v31 = vadd.f32 %v1003_v16, %v1002_v18 }
 0x724   :  { %v1006_v32 = vpack.c.bf16 %v1005_v31, %v1004_v0  ;;  %v1143_v0 = vld [vmem:[#allocation7 + $0x8] sm:$0xff] }
 0x726   :  { %1907 = vmatmul.msk.bf16.vlgmr.msra.gmra.mxu2 %vm223_vm0, %v1006_v32 }
 0x755   :  { %v2029_v33 = vpop.permute.xlu2 %2028 }
 0x756   :  { %v2031_v52 = vunpack.i.h.bf16 %v2029_v33  ;;  %v2030_v53 = vunpack.i.l.bf16 %v2029_v33  ;;  %v1146_v33 = vld [vmem:[#allocation7 + $0x20] sm:$0xff] }
 0x758   :  { %v1137_v55 = vpack.c.bf16 %v2031_v52, %v2031_v52  ;;  %v2846_v56 = vpack.c.bf16 %v2030_v53, %v2030_v53  ;;  %v1147_v52 = vld [vmem:[#allocation7 + $0x28] sm:$0xff] }
 0x75a   :  { %v1471_v57 = vunpack.c.l.b16 %v1137_v55  ;;  %v1192_v58 = vsel %vm399_vm15, %v2846_v56, 0  ;;  %v1211_v59 = vsel %vm399_vm15, %v1137_v55, 0 }
 0x75b   :  { %1201 = vmatpush.bf16.xpose.msrb.mxu2 %v1192_v58  ;;  %1220 = vmatpush.bf16.xpose.msrb.mxu3 %v1211_v59 }
 0x75c   :  { %v1472_v60 = vpack.c.b16 %v1471_v57, %v1471_v57 }
 0x75e   :  { %1473 = vrot.lane.b32.xlu0 %v1472_v60, %s2470_s9 }
 0x76d   :  { %v2039_v63 = vpop.permute.xlu0 %2038 }
 0x76e   :  { %v2041_v1 = vunpack.i.h.bf16 %v2039_v63  ;;  %v2040_v3 = vunpack.i.l.bf16 %v2039_v63 }
 0x770   :  { %v2852_v5 = vpack.c.bf16 %v2041_v1, %v2041_v1  ;;  %v2854_v6 = vpack.c.bf16 %v2040_v3, %v2040_v3  ;;  %v1144_v3 = vld [vmem:[#allocation7 + $0x10] sm:$0xff] }
 0x772   :  { %v1268_v54 = vsel %vm399_vm15, %v2854_v6, 0  ;;  %v1287_v4 = vsel %vm399_vm15, %v2852_v5, 0 }
 0x773   :  { %1277 = vmatpush.bf16.xpose.msra.mxu2 %v1268_v54  ;;  %1296 = vmatpush.bf16.xpose.msra.mxu3 %v1287_v4 }
 0x775   :  { %v2049_v7 = vpop.permute.xlu0 %2048 }
 0x776   :  { %v2051_v8 = vunpack.i.h.bf16 %v2049_v7  ;;  %v2050_v9 = vunpack.i.l.bf16 %v2049_v7 }
 0x778   :  { %v2860_v11 = vpack.c.bf16 %v2051_v8, %v2051_v8  ;;  %v2862_v14 = vpack.c.bf16 %v2050_v9, %v2050_v9 }
 0x77a   :  { %v1230_v15 = vsel %vm399_vm15, %v2862_v14, 0  ;;  %v1249_v16 = vsel %vm399_vm15, %v2860_v11, 0 }
 0x77b   :  { %1239 = vmatpush.bf16.xpose.msra.mxu0 %v1230_v15  ;;  %1258 = vmatpush.bf16.xpose.msra.mxu1 %v1249_v16 }
 0x7a9   :  { %v1039_v43 = vpop.f32.mrf.mxu2 }
 0x7aa   :  { %v1040_v44 = vadd.f32 %v2075_v42, %v1039_v43 }
 0x7ac   :  { %v1106_v46 = vpack.c.bf16 %v1040_v44, %v1040_v44 }
 0x7ae   :  { %1921 = vmatmul.msk.bf16.vlgmr.msrb.gmra.mxu0 %vm399_vm15, %v1106_v46 }
 0x7b1   :  { %v1041_v47 = vpop.f32.mrf.mxu2 }
 0x7b2   :  { %v1042_v48 = vadd.f32 %v2075_v42, %v1041_v47 }
 0x7b4   :  { %v1107_v50 = vpack.c.bf16 %v1042_v48, %v1042_v48  ;;  %v2042_v51 = vpack.i.bf16 %v1042_v48, %v1040_v44 }
 0x7b6   :  { %1922 = vmatmul.msk.bf16.vlgmr.msrb.gmra.mxu1 %vm399_vm15, %v1107_v50  ;;  %2043 = vrot.lane.b32.xlu2 %v2042_v51, %s2467_s22 }
 0x7b7   :  { %2033 = vrot.lane.b32.xlu1 %v2042_v51, %s2468_s23 }
 0x7bf   :  { %2053 = vrot.lane.b32.xlu1 %v2042_v51, %s2469_s24 }
 0x7d0   :  { %v1474_v39 = vpop.permute.xlu0 %1473 }
 0x7d1   :  { %v1479_v41 = vsel %vm688_vm1, %v1474_v39, 0 }
 0x810   :  { %v2044_v32 = vpop.permute.xlu2 %2043 }
 0x811   :  { %v2046_v61 = vunpack.i.h.bf16 %v2044_v32  ;;  %v2045_v35 = vunpack.i.l.bf16 %v2044_v32  ;;  %v1423_v32 = vunpack.c.l.b16 %v2834_v40 }
 0x813   :  { %v1113_v30 = vpack.c.bf16 %v2046_v61, %v2046_v61  ;;  %v1112_v38 = vpack.c.bf16 %v2045_v35, %v2045_v35  ;;  %v1567_v61 = vunpack.c.l.b16 %v2852_v5 }
 0x815   :  { %v1568_v35 = vpack.c.b16 %v1567_v61, %v1567_v61 }
 0x829   :  { %v2034_v17 = vpop.permute.xlu1 %2033 }
 0x82a   :  { %v2036_v20 = vunpack.i.h.bf16 %v2034_v17  ;;  %v2035_v21 = vunpack.i.l.bf16 %v2034_v17 }
 0x82b   :  { %v1165_v22 = vpop.f32.mrf.mxu0 }
 0x82c   :  { %v1109_v23 = vpack.c.bf16 %v2036_v20, %v2036_v20  ;;  %v1108_v25 = vpack.c.bf16 %v2035_v21, %v2035_v21  ;;  %v1166_v26 = vadd.f32 %v1165_v22, %v1142_v19  ;;  %v1145_v19 = vld [vmem:[#allocation7 + $0x18] sm:$0xff] }
 0x82d   :  { %v1149_v20 = vld [vmem:[#allocation7 + $0x38] sm:$0xff] }
 0x82e   :  { %1923 = vmatmul.msk.bf16.vlgmr.msrb.gmra.mxu2 %vm399_vm15, %v1108_v25  ;;  %1924 = vmatmul.msk.bf16.vlgmr.msrb.gmra.mxu3 %vm399_vm15, %v1109_v23  ;;  %v1302_v62 = vsel %vm399_vm15, %v1166_v26, -inf }
 0x82f   :  { %1303 = vmax.xlane.f32.xlu1 %v1302_v62  ;;  %1488 = vmatpush.bf16.msrb.mxu3 %v1479_v41 }
 0x831   :  { %v2054_v28 = vpop.permute.xlu1 %2053 }
 0x832   :  { %v2056_v13 = vunpack.i.h.bf16 %v2054_v28  ;;  %v2055_v45 = vunpack.i.l.bf16 %v2054_v28  ;;  %v1148_v28 = vld [vmem:[#allocation7 + $0x30] sm:$0xff] }
 0x833   :  { %v1167_v12 = vpop.f32.mrf.mxu0  ;;  %v1184_v2 = vpop.f32.mrf.mxu1 }
 0x834   :  { %v1111_v29 = vpack.c.bf16 %v2056_v13, %v2056_v13  ;;  %v1110_v18 = vpack.c.bf16 %v2055_v45, %v2055_v45  ;;  %v1185_v31 = vadd.f32 %v1184_v2, %v1143_v0  ;;  %v1447_v2 = vunpack.c.l.b16 %v2846_v56 }
 0x836   :  { %1925 = vmatmul.msk.bf16.vlgmr.msra.gmra.mxu0 %vm399_vm15, %v1110_v18  ;;  %1926 = vmatmul.msk.bf16.vlgmr.msra.gmra.mxu1 %vm399_vm15, %v1111_v29  ;;  %v1305_v34 = vsel %vm399_vm15, %v1185_v31, -inf  ;;  %v1448_v29 = vpack.c.b16 %v1447_v2, %v1447_v2  ;;  %v1399_v18 = vunpack.c.l.b16 %v2830_v36 }
 0x837   :  { %1306 = vmax.xlane.f32.xlu2 %v1305_v34  ;;  %v1424_v34 = vpack.c.b16 %v1423_v32, %v1423_v32 }
 0x83b   :  { %v1186_v37 = vpop.f32.mrf.mxu1 }
 0x83e   :  { %1927 = vmatmul.msk.bf16.vlgmr.msra.gmra.mxu2 %vm399_vm15, %v1112_v38  ;;  %1928 = vmatmul.msk.bf16.vlgmr.msra.gmra.mxu3 %vm399_vm15, %v1113_v30 }
 0x8a2   :  { %v1304_v42 = vpop.xlane.xlu1 %1303 }
 0x8a3   :  { %v1326_v46 = vsub.f32 %v1166_v26, %v1304_v42 }
 0x8a5   :  { %v1334_v48 = vmul.f32 1.442695, %v1326_v46 }
 0x8aa   :  { %v1307_v43 = vpop.xlane.xlu2 %1306 }
 0x8ab   :  { %v1327_v44 = vsub.f32 %v1185_v31, %v1307_v43  ;;  %v1400_v31 = vpack.c.b16 %v1399_v18, %v1399_v18 }
 0x8ad   :  { %v1336_v47 = vmul.f32 1.442695, %v1327_v44 }
 0x8af   :  { %2131 = vpow2.f32 %v1336_v47 }
 0x8b0   :  { %2133 = vpow2.f32 %v1334_v48 }
 0x8b1   :  { %v1203_v50 = vpop.f32.mrf.mxu2  ;;  %v1222_v51 = vpop.f32.mrf.mxu3 }
 0x8b2   :  { %v1204_v7 = vadd.f32 %v1203_v50, %v1144_v3  ;;  %v1223_v23 = vadd.f32 %v1222_v51, %v1145_v19 }
 0x8b3   :  { %v1241_v53 = vpop.f32.mrf.mxu0  ;;  %v1260_v55 = vpop.f32.mrf.mxu1 }
 0x8b4   :  { %v1242_v57 = vadd.f32 %v1241_v53, %v1146_v33  ;;  %v1261_v58 = vadd.f32 %v1260_v55, %v1147_v52  ;;  %v1308_v17 = vsel %vm399_vm15, %v1204_v7, -inf  ;;  %v1311_v62 = vsel %vm399_vm15, %v1223_v23, -inf }
 0x8b5   :  { %v2877_v59 = vpop.eup %2131 }
 0x8b6   :  { %v1317_v60 = vsel %vm399_vm15, %v1261_v58, -inf  ;;  %v1314_v63 = vsel %vm399_vm15, %v1242_v57, -inf  ;;  %v1353_v1 = vsel %vm399_vm15, %v2877_v59, 0.0  ;;  %v2883_v8 = vpop.eup %2133 }
 0x8b7   :  { %1318 = vmax.xlane.f32.xlu0 %v1317_v60  ;;  %1315 = vmax.xlane.f32.xlu2 %v1314_v63  ;;  %v1350_v16 = vsel %vm399_vm15, %v2883_v8, 0.0 }
 0x8b8   :  { %1354 = vadd.xlane.f32.xlu1 %v1353_v1 }
 0x8b9   :  { %v1205_v54 = vpop.f32.mrf.mxu2  ;;  %v1224_v4 = vpop.f32.mrf.mxu3 }
 0x8bb   :  { %v1243_v9 = vpop.f32.mrf.mxu0  ;;  %v1262_v15 = vpop.f32.mrf.mxu1 }
 0x8bf   :  { %1351 = vadd.xlane.f32.xlu0 %v1350_v16  ;;  %1309 = vmax.xlane.f32.xlu2 %v1308_v17 }
 0x8c1   :  { %v1279_v21 = vpop.f32.mrf.mxu2  ;;  %v1298_v22 = vpop.f32.mrf.mxu3 }
 0x8c2   :  { %v1299_v25 = vadd.f32 %v1298_v22, %v1149_v20  ;;  %v1280_v45 = vadd.f32 %v1279_v21, %v1148_v28 }
 0x8c4   :  { %v1323_v26 = vsel %vm399_vm15, %v1299_v25, -inf  ;;  %v1320_v12 = vsel %vm399_vm15, %v1280_v45, -inf }
 0x8c5   :  { %1324 = vmax.xlane.f32.xlu1 %v1323_v26  ;;  %v1495_v26 = vunpack.c.l.b16 %v2862_v14 }
 0x8c7   :  { %1312 = vmax.xlane.f32.xlu0 %v1311_v62 }
 0x8c9   :  { %v1281_v0 = vpop.f32.mrf.mxu2  ;;  %v1300_v13 = vpop.f32.mrf.mxu3 }
 0x8cf   :  { %1321 = vmax.xlane.f32.xlu0 %v1320_v12 }
 0x8d7   :  { %1449 = vrot.lane.b32.xlu2 %v1448_v29, %s2470_s9 }
 0x8de   :  { %1401 = vrot.lane.b32.xlu1 %v1400_v31, %s2470_s9 }
 0x8e3   :  { %1425 = vrot.lane.b32.xlu0 %v1424_v34, %s2470_s9 }
 0x8eb   :  { %1569 = vrot.lane.b32.xlu0 %v1568_v35, %s2470_s9 }
 0x92a   :  { %v1319_v37 = vpop.xlane.xlu0 %1318  ;;  %v1316_v56 = vpop.xlane.xlu2 %1315 }
 0x92b   :  { %v1331_v30 = vsub.f32 %v1261_v58, %v1319_v37  ;;  %v1330_v38 = vsub.f32 %v1242_v57, %v1316_v56  ;;  %v1355_v36 = vpop.xlane.xlu1 %1354 }
 0x92d   :  { %v1344_v39 = vmul.f32 1.442695, %v1331_v30  ;;  %v1342_v41 = vmul.f32 1.442695, %v1330_v38 }
 0x92f   :  { %2135 = vpow2.f32 %v1344_v39 }
 0x930   :  { %2137 = vpow2.f32 %v1342_v41 }
 0x932   :  { %v1352_v40 = vpop.xlane.xlu0 %1351  ;;  %v1310_v42 = vpop.xlane.xlu2 %1309 }
 0x933   :  { %v1328_v43 = vsub.f32 %v1204_v7, %v1310_v42 }
 0x935   :  { %v2899_v44 = vpop.eup %2135  ;;  %v1338_v46 = vmul.f32 1.442695, %v1328_v43 }
 0x936   :  { %v2901_v47 = vpop.eup %2137  ;;  %v1365_v5 = vsel %vm399_vm15, %v2899_v44, 0.0 }
 0x937   :  { %2139 = vpow2.f32 %v1338_v46  ;;  %1366 = vadd.xlane.f32.xlu2 %v1365_v5  ;;  %v1362_v48 = vsel %vm399_vm15, %v2901_v47, 0.0 }
 0x938   :  { %1363 = vadd.xlane.f32.xlu1 %v1362_v48  ;;  %v1325_v50 = vpop.xlane.xlu1 %1324 }
 0x939   :  { %v1333_v51 = vsub.f32 %v1299_v25, %v1325_v50  ;;  %v1519_v25 = vunpack.c.l.b16 %v2860_v11 }
 0x93a   :  { %v1313_v33 = vpop.xlane.xlu0 %1312  ;;  %v1450_v52 = vpop.permute.xlu2 %1449 }
 0x93b   :  { %v1348_v53 = vmul.f32 1.442695, %v1333_v51  ;;  %v1329_v55 = vsub.f32 %v1223_v23, %v1313_v33  ;;  %v1455_v57 = vsel %vm688_vm1, %v1450_v52, 0 }
 0x93c   :  { %1464 = vmatpush.bf16.msrb.mxu2 %v1455_v57 }
 0x93d   :  { %v2140_v58 = vpop.eup %2139  ;;  %2141 = vpow2.f32 %v1348_v53  ;;  %v1340_v60 = vmul.f32 1.442695, %v1329_v55 }
 0x93e   :  { %v1356_v63 = vsel %vm399_vm15, %v2140_v58, 0.0 }
 0x93f   :  { %2143 = vpow2.f32 %v1340_v60 }
 0x940   :  { %1357 = vadd.xlane.f32.xlu1 %v1356_v63  ;;  %2145 = vrcp.f32 %v1352_v40 }
 0x942   :  { %v1322_v1 = vpop.xlane.xlu0 %1321 }
 0x943   :  { %v2909_v3 = vpop.eup %2141  ;;  %v1332_v54 = vsub.f32 %v1280_v45, %v1322_v1  ;;  %v1520_v45 = vpack.c.b16 %v1519_v25, %v1519_v25 }
 0x944   :  { %v1371_v4 = vsel %vm399_vm15, %v2909_v3, 0.0 }
 0x945   :  { %v2144_v7 = vpop.eup %2143  ;;  %v1346_v9 = vmul.f32 1.442695, %v1332_v54  ;;  %1372 = vadd.xlane.f32.xlu0 %v1371_v4 }
 0x946   :  { %v1359_v15 = vsel %vm399_vm15, %v2144_v7, 0.0  ;;  %v2146_v16 = vpop.eup %2145 }
 0x947   :  { %2147 = vpow2.f32 %v1346_v9  ;;  %1360 = vadd.xlane.f32.xlu2 %v1359_v15  ;;  %v1382_v20 = vmul.f32 %v2146_v16, %v2883_v8  ;;  %v1496_v8 = vpack.c.b16 %v1495_v26, %v1495_v26 }
 0x948   :  { %2149 = vrcp.f32 %v1355_v36 }
 0x949   :  { %v1390_v62 = vpack.c.bf16 %v1382_v20, %v1382_v20 }
 0x94d   :  { %v2148_v17 = vpop.eup %2147 }
 0x94e   :  { %v1368_v19 = vsel %vm399_vm15, %v2148_v17, 0.0  ;;  %v2150_v22 = vpop.eup %2149 }
 0x94f   :  { %1369 = vadd.xlane.f32.xlu2 %v1368_v19  ;;  %v1383_v28 = vmul.f32 %v2150_v22, %v2877_v59  ;;  %v1543_v59 = vunpack.c.l.b16 %v2854_v6 }
 0x950   :  { %v1402_v21 = vpop.permute.xlu1 %1401 }
 0x951   :  { %v1407_v23 = vsel %vm688_vm1, %v1402_v21, 0  ;;  %v1391_v12 = vpack.c.bf16 %v1383_v28, %v1383_v28  ;;  %v1544_v2 = vpack.c.b16 %v1543_v59, %v1543_v59  ;;  %v1981_v28 = vld [vmem:[#allocation16] sm:$0xff] }
 0x952   :  { %1416 = vmatpush.bf16.msrb.mxu0 %v1407_v23 }
 0x955   :  { %1929 = vmatmul.msk.bf16.vlgmr.msrb.gmra.mxu0 %vm399_vm15, %v1390_v62  ;;  %v1426_v0 = vpop.permute.xlu0 %1425  ;;  %v1982_v62 = vld [vmem:[#allocation16 + $0x8] sm:$0xff] }
 0x956   :  { %v1431_v13 = vsel %vm688_vm1, %v1426_v0, 0 }
 0x957   :  { %1440 = vmatpush.bf16.msrb.mxu1 %v1431_v13 }
 0x959   :  { %1497 = vrot.lane.b32.xlu1 %v1496_v8, %s2470_s9  ;;  %1521 = vrot.lane.b32.xlu0 %v1520_v45, %s2470_s9 }
 0x95a   :  { %1930 = vmatmul.msk.bf16.vlgmr.msrb.gmra.mxu1 %vm399_vm15, %v1391_v12 }
 0x95d   :  { %v1570_v11 = vpop.permute.xlu0 %1569 }
 0x95e   :  { %v1575_v14 = vsel %vm688_vm1, %v1570_v11, 0 }
 0x95f   :  { %1584 = vmatpush.bf16.msra.mxu3 %v1575_v14 }
 0x967   :  { %1545 = vrot.lane.b32.xlu2 %v1544_v2, %s2470_s9 }
 0x9aa   :  { %v1367_v18 = vpop.xlane.xlu2 %1366 }
 0x9ab   :  { %v1364_v29 = vpop.xlane.xlu1 %1363 }
 0x9b3   :  { %v1358_v31 = vpop.xlane.xlu1 %1357 }
 0x9b4   :  { %2151 = vrcp.f32 %v1358_v31 }
 0x9b8   :  { %v1373_v6 = vpop.xlane.xlu0 %1372 }
 0x9ba   :  { %v2152_v32 = vpop.eup %2151  ;;  %v1361_v34 = vpop.xlane.xlu2 %1360 }
 0x9bb   :  { %v1384_v61 = vmul.f32 %v2152_v32, %v2140_v58  ;;  %2153 = vrcp.f32 %v1361_v34 }
 0x9bc   :  { %2155 = vrcp.f32 %v1367_v18 }
 0x9bd   :  { %v1392_v35 = vpack.c.bf16 %v1384_v61, %v1384_v61  ;;  %2157 = vrcp.f32 %v1364_v29 }
 0x9bf   :  { %1931 = vmatmul.msk.bf16.vlgmr.msrb.gmra.mxu2 %vm399_vm15, %v1392_v35 }
 0x9c1   :  { %v2154_v37 = vpop.eup %2153 }
 0x9c2   :  { %v1385_v56 = vmul.f32 %v2154_v37, %v2144_v7  ;;  %v1370_v30 = vpop.xlane.xlu2 %1369  ;;  %v2156_v39 = vpop.eup %2155  ;;  %v2076_v37 = vld [vmem:[%s3029_s13] ss:$0 sm:$0xff] }
 0x9c3   :  { %2159 = vrcp.f32 %v1370_v30  ;;  %v2158_v41 = vpop.eup %2157  ;;  %v1387_v40 = vmul.f32 %v2156_v39, %v2899_v44 }
 0x9c4   :  { %v1393_v38 = vpack.c.bf16 %v1385_v56, %v1385_v56  ;;  %2161 = vrcp.f32 %v1373_v6  ;;  %v1386_v42 = vmul.f32 %v2158_v41, %v2901_v47 }
 0x9c5   :  { %v1395_v55 = vpack.c.bf16 %v1387_v40, %v1387_v40 }
 0x9c6   :  { %1932 = vmatmul.msk.bf16.vlgmr.msrb.gmra.mxu3 %vm399_vm15, %v1393_v38  ;;  %v1394_v57 = vpack.c.bf16 %v1386_v42, %v1386_v42 }
 0x9c9   :  { %v2160_v36 = vpop.eup %2159 }
 0x9ca   :  { %v1388_v43 = vmul.f32 %v2160_v36, %v2148_v17  ;;  %v1546_v46 = vpop.permute.xlu2 %1545  ;;  %v2162_v53 = vpop.eup %2161 }
 0x9cb   :  { %v1498_v5 = vpop.permute.xlu1 %1497  ;;  %v1551_v48 = vsel %vm688_vm1, %v1546_v46, 0  ;;  %v1522_v50 = vpop.permute.xlu0 %1521  ;;  %v1389_v44 = vmul.f32 %v2162_v53, %v2909_v3 }
 0x9cc   :  { %v1396_v51 = vpack.c.bf16 %v1388_v43, %v1388_v43  ;;  %v1503_v33 = vsel %vm688_vm1, %v1498_v5, 0  ;;  %v1527_v52 = vsel %vm688_vm1, %v1522_v50, 0  ;;  %1560 = vmatpush.bf16.msra.mxu2 %v1551_v48 }
 0x9cd   :  { %1512 = vmatpush.bf16.msra.mxu0 %v1503_v33  ;;  %1536 = vmatpush.bf16.msra.mxu1 %v1527_v52  ;;  %v1397_v58 = vpack.c.bf16 %v1389_v44, %v1389_v44 }
 0x9cf   :  { %1935 = vmatmul.msk.bf16.vlgmr.msra.gmra.mxu2 %vm399_vm15, %v1396_v51 }
 0x9d0   :  { %1933 = vmatmul.msk.bf16.vlgmr.msra.gmra.mxu0 %vm399_vm15, %v1394_v57  ;;  %1934 = vmatmul.msk.bf16.vlgmr.msra.gmra.mxu1 %vm399_vm15, %v1395_v55  ;;  %v1984_v55 = vld [vmem:[#allocation17 + $0x8] sm:$0xff]  ;;  %v1983_v57 = vld [vmem:[#allocation17] sm:$0xff] }
 0x9d1   :  { %1650 = vmatpush.bf16.msrb.mxu0 %v1982_v62  ;;  %1772 = vmatpush.bf16.msrb.mxu1 %v1984_v55  ;;  %v2077_v55 = vld [vmem:[%s3031_s15] ss:$0 sm:$0xff]  ;;  %s2473_s15 = smov [#allocation19]  }
 0x9d2   :  { %v1418_v47 = vpop.f32.mrf.mxu0 }
 0x9d5   :  { %1651 = vmatpush.bf16.msrb.mxu0 %v1981_v28  ;;  %1773 = vmatpush.bf16.msrb.mxu1 %v1983_v57 }
 0x9d6   :  { %1936 = vmatmul.msk.bf16.vlgmr.msra.gmra.mxu3 %vm399_vm15, %v1397_v58 }
 0x9d7   :  { %v1442_v60 = vpop.f32.mrf.mxu1 }
 0x9da   :  { %v1420_v63 = vpop.f32.mrf.mxu0 }
 0x9df   :  { %v1444_v1 = vpop.f32.mrf.mxu1 }
 0xa42   :  { %v1466_v54 = vpop.f32.mrf.mxu2 }
 0xa49   :  { %v1490_v4 = vpop.f32.mrf.mxu3 }
 0xa4a   :  { %v1468_v7 = vpop.f32.mrf.mxu2  ;;  %v2057_v9 = vpack.i.bf16 %v1490_v4, %v1466_v54 }
 0xa4c   :  { %2058 = vrot.lane.b32.xlu2 %v2057_v9, %s2453_s4 }
 0xa4d   :  { %v1514_v15 = vpop.f32.mrf.mxu0  ;;  %v1538_v16 = vpop.f32.mrf.mxu1 }
 0xa4e   :  { %v2062_v3 = vpack.i.bf16 %v1538_v16, %v1514_v15 }
 0xa50   :  { %2063 = vrot.lane.b32.xlu1 %v2062_v3, %s2472_s27 }
 0xa51   :  { %v1492_v17 = vpop.f32.mrf.mxu3 }
 0xa52   :  { %v1562_v19 = vpop.f32.mrf.mxu2 }
 0xa55   :  { %v1516_v20 = vpop.f32.mrf.mxu0  ;;  %v1540_v21 = vpop.f32.mrf.mxu1 }
 0xa59   :  { %v1586_v22 = vpop.f32.mrf.mxu3 }
 0xa5a   :  { %v2067_v23 = vpack.i.bf16 %v1586_v22, %v1562_v19  ;;  %v1564_v25 = vpop.f32.mrf.mxu2 }
 0xa5c   :  { %2068 = vrot.lane.b32.xlu0 %v2067_v23, %s2471_s26 }
 0xa61   :  { %v1588_v26 = vpop.f32.mrf.mxu3 }
 0xaa6   :  { %v2059_v0 = vpop.permute.xlu2 %2058 }
 0xaa7   :  { %v2061_v8 = vunpack.i.h.bf16 %v2059_v0  ;;  %v2060_v45 = vunpack.i.l.bf16 %v2059_v0 }
 0xaa9   :  { %v1614_v59 = vsel %vm399_vm15, %v1418_v47, %v2060_v45  ;;  %v1615_v2 = vsel %vm399_vm15, %v1442_v60, %v2061_v8  ;;  %v2171_v45 = vld [vmem:[%s3034_s18] sm:$0x7] }
 0xac2   :  { %v2064_v13 = vpop.permute.xlu1 %2063 }
 0xac3   :  { %v2066_v12 = vunpack.i.h.bf16 %v2064_v13  ;;  %v2065_v11 = vunpack.i.l.bf16 %v2064_v13 }
 0xac5   :  { %v1617_v31 = vsel %vm878_vm2, %v1615_v2, %v2066_v12  ;;  %v1616_v32 = vsel %vm878_vm2, %v1614_v59, %v2065_v11  ;;  %v1704_v12 = vperm.slane %v2171_v45, 2 }
 0xace   :  { %v2069_v14 = vpop.permute.xlu0 %2068 }
 0xacf   :  { %v2071_v29 = vunpack.i.h.bf16 %v2069_v14  ;;  %v2070_v18 = vunpack.i.l.bf16 %v2069_v14 }
 0xad1   :  { %v1619_v34 = vsel %vm881_vm3, %v1617_v31, %v2071_v29  ;;  %v1618_v61 = vsel %vm881_vm3, %v1616_v32, %v2070_v18  ;;  %v2172_v29 = vld [vmem:[%s3035_s19] sm:$0x7] }
 0xad2   :  { %v1620_v35 = vpack.c.bf16 %v1619_v34, %v1618_v61  ;;  %v1739_v18 = vperm.slane %v2172_v29, 2 }
 0xad4   :  { %1945 = vmatmul.msk.bf16.vlgmr.msrb.gmra.mxu0 %vm223_vm0, %v1620_v35 }
 0xb51   :  { %v1653_v56 = vpop.f32.mrf.mxu0 }
 0xb52   :  { %v1654_v30 = vadd.f32 %v2076_v37, %v1653_v56 }
 0xb54   :  { %v2954_v6 = vadd.f32 %v1654_v30, %v2796_v49 }
 0xb56   :  { %v1660_v38 = vsel %vm223_vm0, %v2954_v6, 0.0 }
 0xb57   :  { %1661 = vadd.xlane.f32.xlu2 %v1660_v38 }
 0xb59   :  { %v1655_v39 = vpop.f32.mrf.mxu0 }
 0xb5a   :  { %v1656_v41 = vadd.f32 %v2076_v37, %v1655_v39 }
 0xb5c   :  { %v2959_v36 = vadd.f32 %v1656_v41, %v2801_v24 }
 0xb5e   :  { %v1663_v40 = vsel %vm223_vm0, %v2959_v36, 0.0 }
 0xb5f   :  { %1664 = vadd.xlane.f32.xlu1 %v1663_v40 }
 0xbca   :  { %v1662_v42 = vpop.xlane.xlu2 %1661 }
 0xbcb   :  { %v1666_v43 = vmul.f32 %v1662_v42, %v2644_v10 }
 0xbcd   :  { %v2965_v46 = vsub.f32 %v2954_v6, %v1666_v43 }
 0xbcf   :  { %v1670_v49 = vmul.f32 %v2965_v46, %v2965_v46  ;;  %v1705_v32 = vmul.f32 %v1704_v12, %v2965_v46 }
 0xbd1   :  { %v1672_v5 = vsel %vm223_vm0, %v1670_v49, 0.0 }
 0xbd2   :  { %v1665_v48 = vpop.xlane.xlu1 %1664  ;;  %1673 = vadd.xlane.f32.xlu0 %v1672_v5 }
 0xbd3   :  { %v1667_v24 = vmul.f32 %v1665_v48, %v2644_v10 }
 0xbd5   :  { %v2972_v50 = vsub.f32 %v2959_v36, %v1667_v24 }
 0xbd7   :  { %v1671_v51 = vmul.f32 %v2972_v50, %v2972_v50  ;;  %v1706_v43 = vmul.f32 %v1704_v12, %v2972_v50  ;;  %v1986_v50 = vld [vmem:[%s3032_s16 + $0x8] sm:$0xff] }
 0xbd9   :  { %v1675_v33 = vsel %vm223_vm0, %v1671_v51, 0.0  ;;  %v1988_v51 = vld [vmem:[%s3032_s16 + $0x18] sm:$0xff] }
 0xbda   :  { %1676 = vadd.xlane.f32.xlu2 %v1675_v33  ;;  %1827 = vmatpush.bf16.msrb.mxu2 %v1988_v51  ;;  %v1987_v33 = vld [vmem:[%s3032_s16 + $0x10] sm:$0xff] }
 0xbde   :  { %1828 = vmatpush.bf16.msrb.mxu2 %v1987_v33 }
 0xbe2   :  { %1829 = vmatpush.bf16.msrb.mxu2 %v1986_v50 }
 0xc45   :  { %v1674_v52 = vpop.xlane.xlu0 %1673 }
 0xc46   :  { %v1678_v53 = vmul.f32 %v1674_v52, %v2660_v27  ;;  %v1985_v52 = vld [vmem:[%s3032_s16] sm:$0xff]  ;;  %s1845_s16 = sshll.u32 %s2473_s15, 4  ;;  %s1846_s16 = int_to_ptr.vmem [resolvable:$true] %s1845_s16 }
 0xc47   :  { %1830 = vmatpush.bf16.msrb.mxu2 %v1985_v52 }
 0xc48   :  { %2163 = vrsqrt.f32 %v1678_v53  ;;  %vm1687_vm15 = vcmp.eq.f32.partialorder %v1678_v53, inf  ;;  %v1690_v16 = vand.u32 2147483648, %v1678_v53  ;;  %vm1689_vm1 = vcmp.eq.f32.partialorder %v1678_v53, 0.0 }
 0xc4d   :  { %v1677_v44 = vpop.xlane.xlu2 %1676 }
 0xc4e   :  { %v2164_v47 = vpop.eup %2163  ;;  %v1679_v10 = vmul.f32 %v1677_v44, %v2660_v27 }
 0xc4f   :  { %v1681_v58 = vmul.f32 %v2164_v47, %v1678_v53 }
 0xc50   :  { %2165 = vrsqrt.f32 %v1679_v10  ;;  %vm1699_vm2 = vcmp.eq.f32.partialorder %v1679_v10, inf  ;;  %v1702_v23 = vand.u32 2147483648, %v1679_v10  ;;  %vm1701_vm3 = vcmp.eq.f32.partialorder %v1679_v10, 0.0 }
 0xc51   :  { %v1682_v60 = vmul.f32 %v2164_v47, %v1681_v58 }
 0xc53   :  { %v1683_v63 = vmul.f32 0.5, %v1682_v60 }
 0xc55   :  { %v1684_v1 = vsub.f32 1.5, %v1683_v63  ;;  %v2078_v63 = vld [vmem:[%s3033_s17] ss:$0 sm:$0xff] }
 0xc56   :  { %v2166_v54 = vpop.eup %2165 }
 0xc57   :  { %v1685_v4 = vmul.f32 %v2164_v47, %v1684_v1  ;;  %v1693_v7 = vmul.f32 %v2166_v54, %v1679_v10 }
 0xc59   :  { %v1686_v9 = vmul.f32 %v1685_v4, %v1678_v53  ;;  %v1694_v15 = vmul.f32 %v2166_v54, %v1693_v7 }
 0xc5b   :  { %v1688_v3 = vsel %vm1687_vm15, %v1678_v53, %v1686_v9  ;;  %v1695_v17 = vmul.f32 0.5, %v1694_v15 }
 0xc5c   :  { %v1691_v19 = vsel %vm1689_vm1, %v1690_v16, %v1688_v3 }
 0xc5d   :  { %v1707_v20 = vadd.f32 1e-06, %v1691_v19  ;;  %v1696_v21 = vsub.f32 1.5, %v1695_v17 }
 0xc5f   :  { %2167 = vrcp.f32 %v1707_v20  ;;  %v1697_v27 = vmul.f32 %v2166_v54, %v1696_v21  ;;  %v1720_v8 = vand.u32 2147483648, %v1707_v20  ;;  %v1718_v14 = vand.u32 2147483647, %v1707_v20 }
 0xc60   :  { %vm1714_vm6 = vweird.f32 %v1707_v20 }
 0xc61   :  { %v1698_v22 = vmul.f32 %v1697_v27, %v1679_v10  ;;  %v1721_v31 = vor.u32 1.1754944e-38, %v1720_v8  ;;  %vm1719_vm8 = vcmp.eq.f32.partialorder %v1718_v14, 8.507059e+37 }
 0xc63   :  { %v1700_v25 = vsel %vm1699_vm2, %v1679_v10, %v1698_v22 }
 0xc64   :  { %v1703_v26 = vsel %vm1701_vm3, %v1702_v23, %v1700_v25 }
 0xc65   :  { %v2168_v62 = vpop.eup %2167  ;;  %v1708_v28 = vadd.f32 1e-06, %v1703_v26 }
 0xc66   :  { %v1710_v0 = vmul.f32 %v2168_v62, %v1707_v20  ;;  %vm1715_vm5 = vweird.f32 %v2168_v62 }
 0xc67   :  { %2169 = vrcp.f32 %v1708_v28  ;;  %vm1716_vm7 = vmor %vm1714_vm6, %vm1715_vm5  ;;  %v1735_v30 = vand.u32 2147483648, %v1708_v28  ;;  %v1733_v39 = vand.u32 2147483647, %v1708_v28  ;;  %vm1729_vm10 = vweird.f32 %v1708_v28 }
 0xc68   :  { %v1711_v13 = vsub.f32 1.0, %v1710_v0 }
 0xc69   :  { %v1736_v42 = vor.u32 1.1754944e-38, %v1735_v30  ;;  %vm1734_vm12 = vcmp.eq.f32.partialorder %v1733_v39, 8.507059e+37 }
 0xc6a   :  { %v1712_v11 = vmul.f32 %v2168_v62, %v1711_v13 }
 0xc6c   :  { %v1713_v59 = vadd.f32 %v2168_v62, %v1712_v11 }
 0xc6d   :  { %v2170_v2 = vpop.eup %2169 }
 0xc6e   :  { %v1717_v34 = vsel %vm1716_vm7, %v2168_v62, %v1713_v59  ;;  %v1725_v61 = vmul.f32 %v2170_v2, %v1708_v28  ;;  %vm1730_vm9 = vweird.f32 %v2170_v2 }
 0xc6f   :  { %v1722_v35 = vsel %vm1719_vm8, %v1721_v31, %v1717_v34  ;;  %vm1731_vm11 = vmor %vm1729_vm10, %vm1730_vm9 }
 0xc70   :  { %v1723_v37 = vmul.f32 %v1722_v35, %v1705_v32  ;;  %v1726_v56 = vsub.f32 1.0, %v1725_v61 }
 0xc72   :  { %v1727_v38 = vmul.f32 %v2170_v2, %v1726_v56  ;;  %v1740_v41 = vadd.f32 %v1739_v18, %v1723_v37 }
 0xc74   :  { %v1728_v40 = vadd.f32 %v2170_v2, %v1727_v38 }
 0xc76   :  { %v1732_v49 = vsel %vm1731_vm11, %v2170_v2, %v1728_v40 }
 0xc77   :  { %v1737_v46 = vsel %vm1734_vm12, %v1736_v42, %v1732_v49 }
 0xc78   :  { %v1738_v5 = vmul.f32 %v1737_v46, %v1706_v43 }
 0xc7a   :  { %v1741_v48 = vadd.f32 %v1739_v18, %v1738_v5 }
 0xc7c   :  { %v1742_v24 = vpack.c.bf16 %v1741_v48, %v1740_v41 }
 0xc7e   :  { %1954 = vmatmul.msk.bf16.vlgmr.msrb.gmra.mxu1 %vm223_vm0, %v1742_v24 }
 0xcfb   :  { %v1775_v53 = vpop.f32.mrf.mxu1 }
 0xcfc   :  { %v1776_v57 = vadd.f32 %v2077_v55, %v1775_v53 }
 0xcfe   :  { %v1780_v10 = vmax.f32 %v1776_v57, 0.0 }
 0xd03   :  { %v1777_v44 = vpop.f32.mrf.mxu1 }
 0xd04   :  { %v1778_v47 = vadd.f32 %v2077_v55, %v1777_v44 }
 0xd06   :  { %v1781_v58 = vmax.f32 %v1778_v47, 0.0 }
 0xd08   :  { %v1782_v60 = vpack.c.bf16 %v1781_v58, %v1780_v10 }
 0xd0a   :  { %1971 = vmatmul.msk.bf16.vlgmr.msrb.gmra.mxu2 %vm1819_vm13, %v1782_v60 }
 0xd8d   :  { %v1832_v1 = vpop.f32.mrf.mxu2 }
 0xd8e   :  { %v1833_v54 = vadd.f32 %v2078_v63, %v1832_v1 }
 0xd90   :  { %v1837_v4 = vadd.f32 %v1833_v54, %v2954_v6 }
 0xd92   :  { %1839 = vst.msk [vmem:[#allocation19] sm:$0xff] %vm223_vm0, %v1837_v4 }
 0xd95   :  { %v1834_v7 = vpop.f32.mrf.mxu2 }
 0xd96   :  { %v1835_v9 = vadd.f32 %v2078_v63, %v1834_v7 }
 0xd98   :  { %v1838_v15 = vadd.f32 %v1835_v9, %v2959_v36 }
 0xd9a   :  { %1840 = vst.msk [vmem:[#allocation19 + $0x8] sm:$0xff] %vm223_vm0, %v1838_v15 }
 0xd9b   :  { %1853 = dma.vmem_to_hbm [thread:$0]  %s1846_s16, 256, %s1848_s12, [#allocation4], %s2452_s28, %s2452_s28, %s2453_s4  }
 0xd9c   :  { %2449 = dma.done.wait [#allocation4], 256  }
 0xd9d   :  { %2450 = vsyncadd [#allocation4], 4294967040 }
 0xd9e   :  { %1858 = vsyncpa [#allocation3], 1 }
 0xd9f   :  { %1859 = vsyncpa [#allocation6], 1 }
 0xda0   :  { %1860 = vsyncpa [#allocation9], 1 }
 0xda1   :  { %1861 = vsyncpa [#allocation12], 1 }
 0xda2   :  { %1862 = vsyncpa [#allocation15], 1 }
 0xda3   :  { %1863 = vsyncpa [#allocation18], 1 }
 0xda4   :  { %1864 = vsyncpa [#allocation4], 1 }

</bundles_post_ra>
